<compile_context>
chip_gen: v6e
topology: v6e:2x2x1
jax: 0.10.0
libtpu: 0.0.40
codegen_flags: <defaults>
</compile_context>

<pallas_src>
import jax
import jax.numpy as jnp
from jax.experimental import pallas as pl
from jax.experimental.pallas import tpu as pltpu


def _round_up(x, m):
    return ((x + m - 1) // m) * m


# ------------------------- fused forward kernel -----------------------------
def fused_net_kernel(tok_ref, emb_ref, wih_ref, whh_ref, gb_ref, fcw_ref, fcb_ref,
                     out_ref, x_scr, xp_scr, h_scr):
    """Embedding gather -> hoisted x-projection -> unrolled LSTM -> Linear -> log_softmax.

    All scratch/output rows are time-major: row = t*B + b.
    """
    B, T = tok_ref.shape
    V = emb_ref.shape[0]
    Hp = whh_ref.shape[0]            # padded hidden size (multiple of 128)
    H3 = 3 * Hp

    # ---- 1. Embedding gather, fully off the serial recurrence chain.
    #         Scalar token ids live in SMEM; rows are clamped to avoid OOB VMEM reads.
    for t in range(T):
        for b in range(B):
            tid = jnp.minimum(jnp.maximum(tok_ref[b, t], 0), V - 1)
            x_scr[pl.ds(t * B + b, 1), :] = emb_ref[pl.ds(tid, 1), :]

    # ---- 2. Hoisted input projection: one MXU matmul for all B*T rows,
    #         with the (b_ih + b_hh) gate bias folded in (broadcast emitted once).
    xp_scr[...] = jnp.dot(x_scr[...], wih_ref[...],
                          preferred_element_type=jnp.float32) + gb_ref[...]

    # ---- 3. Recurrence: only h @ W_hh (K = Hp) sits on the serial T-step chain.
    #         Gate column order is (i, f, o, g): one sigmoid over 3*Hp, one tanh over Hp.
    w_hh = whh_ref[...]                               # hoisted load, (Hp, 4Hp)
    h = jnp.zeros((B, Hp), jnp.float32)
    c = jnp.zeros((B, Hp), jnp.float32)
    for t in range(T):                                # T is small & static: unrolled
        gates = xp_scr[pl.ds(t * B, B), :] + jnp.dot(
            h, w_hh, preferred_element_type=jnp.float32)          # (B, 4Hp)
        sig = jax.nn.sigmoid(gates[:, :H3])                        # i | f | o
        g_g = jnp.tanh(gates[:, H3:])                              # g
        c = sig[:, Hp:2 * Hp] * c + sig[:, :Hp] * g_g
        h = sig[:, 2 * Hp:H3] * jnp.tanh(c)
        h_scr[pl.ds(t * B, B), :] = h                 # single small store per step

    # ---- 4. Fused Linear + log_softmax over all T*B rows at once.
    logits = jnp.dot(h_scr[...], fcw_ref[...],
                     preferred_element_type=jnp.float32) + fcb_ref[...]   # (T*B, C)
    z = logits - jnp.max(logits, axis=-1, keepdims=True)
    lse = jnp.log(jnp.sum(jnp.exp(z), axis=-1, keepdims=True))
    out_ref[...] = (z - lse).astype(out_ref.dtype)


def net_forward(tokens, params):
    B, T = tokens.shape
    Ep = params["emb"].shape[1]
    Hp = params["w_hh"].shape[0]
    C = params["fc_b"].shape[-1]

    out_tm = pl.pallas_call(
        fused_net_kernel,
        out_shape=jax.ShapeDtypeStruct((T * B, C), jnp.float32),
        in_specs=[
            pl.BlockSpec(memory_space=pltpu.MemorySpace.SMEM),   # token ids (B, T)
            pl.BlockSpec(memory_space=pltpu.MemorySpace.VMEM),   # embedding table (V, Ep)
            pl.BlockSpec(memory_space=pltpu.MemorySpace.VMEM),   # W_ih^T padded (Ep, 4Hp)
            pl.BlockSpec(memory_space=pltpu.MemorySpace.VMEM),   # W_hh^T padded (Hp, 4Hp)
            pl.BlockSpec(memory_space=pltpu.MemorySpace.VMEM),   # gate bias (1, 4Hp)
            pl.BlockSpec(memory_space=pltpu.MemorySpace.VMEM),   # fc W^T (Hp, C)
            pl.BlockSpec(memory_space=pltpu.MemorySpace.VMEM),   # fc bias (1, C)
        ],
        out_specs=pl.BlockSpec(memory_space=pltpu.MemorySpace.VMEM),
        scratch_shapes=[
            pltpu.VMEM((T * B, Ep), jnp.float32),        # gathered embeddings (time-major)
            pltpu.VMEM((T * B, 4 * Hp), jnp.float32),    # precomputed x-projection
            pltpu.VMEM((T * B, Hp), jnp.float32),        # hidden states (time-major)
        ],
    )(tokens, params["emb"], params["w_ih"], params["w_hh"],
      params["gate_bias"], params["fc_w_t"], params["fc_b"])

    # Kernel rows are time-major (t*B + b); reorder once to PyTorch's batch-first
    # flatten (b*T + t) with a tiny XLA transpose outside the kernel.
    return out_tm.reshape(T, B, C).transpose(1, 0, 2).reshape(B * T, C)


# --------------------------- parameter init ----------------------------------
def init_params(key, vocab_size, embedding_dim, lstm_hidden_dim, number_of_tags):
    E, H, C = embedding_dim, lstm_hidden_dim, number_of_tags
    Ep, Hp = _round_up(E, 128), _round_up(H, 128)

    ks = jax.random.split(key, 7)
    kH = 1.0 / jnp.sqrt(jnp.float32(H))
    # nn.Embedding: N(0, 1)
    embedding = jax.random.normal(ks[0], (vocab_size, E), jnp.float32)
    # nn.LSTM: U(-1/sqrt(H), 1/sqrt(H)), PyTorch gate order (i, f, g, o)
    w_ih = jax.random.uniform(ks[1], (4 * H, E), jnp.float32, -kH, kH)
    w_hh = jax.random.uniform(ks[2], (4 * H, H), jnp.float32, -kH, kH)
    b_ih = jax.random.uniform(ks[3], (4 * H,), jnp.float32, -kH, kH)
    b_hh = jax.random.uniform(ks[4], (4 * H,), jnp.float32, -kH, kH)
    # nn.Linear: U(-1/sqrt(in), 1/sqrt(in))
    fc_w = jax.random.uniform(ks[5], (C, H), jnp.float32, -kH, kH)
    fc_b = jax.random.uniform(ks[6], (C,), jnp.float32, -kH, kH)

    def pack_gates(w):
        """(rows, 4H) in PyTorch order (i,f,g,o) -> (rows, 4Hp) in kernel order (i,f,o,g).

        Each gate block is ZERO-padded to Hp lanes; the kernel's exactness depends on
        these pads (and the padded W_hh/fc rows below) staying zero.
        """
        i_, f_, g_, o_ = (w[:, k * H:(k + 1) * H] for k in range(4))
        pad = lambda m: jnp.pad(m, ((0, 0), (0, Hp - H)))
        return jnp.concatenate([pad(i_), pad(f_), pad(o_), pad(g_)], axis=1)

    w_ih_p = jnp.pad(pack_gates(jnp.transpose(w_ih)), ((0, Ep - E), (0, 0)))  # (Ep, 4Hp)
    w_hh_p = jnp.pad(pack_gates(jnp.transpose(w_hh)), ((0, Hp - H), (0, 0)))  # (Hp, 4Hp)

    return {
        "emb": jnp.pad(embedding, ((0, 0), (0, Ep - E))),             # (V, Ep)
        "w_ih": w_ih_p,                                               # (Ep, 4Hp)
        "w_hh": w_hh_p,                                               # (Hp, 4Hp)
        "gate_bias": pack_gates((b_ih + b_hh).reshape(1, 4 * H)),     # (1, 4Hp)
        "fc_w_t": jnp.pad(jnp.transpose(fc_w), ((0, Hp - H), (0, 0))),  # (Hp, C)
        "fc_b": fc_b.reshape(1, C),                                   # (1, C)
    }


if __name__ == "__main__":
    VOCAB, EMB, HID, TAGS = 50, 32, 32, 8
    B, T = 2, 8

    key = jax.random.PRNGKey(0)
    k_tok, k_par = jax.random.split(key)
    params = init_params(k_par, VOCAB, EMB, HID, TAGS)
    tokens = jax.random.randint(k_tok, (B, T), 0, VOCAB, dtype=jnp.int32)

    out = jax.jit(net_forward)(tokens, params)                        # (B*T, TAGS)
    jax.block_until_ready(out)
    assert out.shape == (B * T, TAGS)
    assert bool(jnp.all(jnp.isfinite(out)))
    print("KERNEL_OK")
</pallas_src>

<mosaic_0001>
module attributes {stable_mosaic.version = 11 : i64} {
  func.func @fused_net_kernel(%arg0: memref<2x8xi32, #tpu.memory_space<smem>>, %arg1: memref<50x128xf32, #tpu.memory_space<vmem>>, %arg2: memref<128x512xf32, #tpu.memory_space<vmem>>, %arg3: memref<128x512xf32, #tpu.memory_space<vmem>>, %arg4: memref<1x512xf32, #tpu.memory_space<vmem>>, %arg5: memref<128x8xf32, #tpu.memory_space<vmem>>, %arg6: memref<1x8xf32, #tpu.memory_space<vmem>>, %arg7: memref<16x8xf32, #tpu.memory_space<vmem>>, %arg8: memref<16x128xf32, #tpu.memory_space<vmem>>, %arg9: memref<16x512xf32, #tpu.memory_space<vmem>>, %arg10: memref<16x128xf32, #tpu.memory_space<vmem>>) attributes {dimension_semantics = [], scalar_prefetch = 0 : i64, scratch_operands = 3 : i64, tpu.core_type = #tpu.core_type<tc>} {
    %c0 = arith.constant 0 : index
    %c0_0 = arith.constant 0 : index
    %0 = memref.load %arg0[%c0, %c0_0] : memref<2x8xi32, #tpu.memory_space<smem>>
    %c0_i32 = arith.constant 0 : i32
    %1 = arith.maxsi %0, %c0_i32 : i32
    %c49_i32 = arith.constant 49 : i32
    %2 = arith.minsi %1, %c49_i32 : i32
    %3 = arith.index_cast %2 : i32 to index
    %c0_1 = arith.constant 0 : index
    %4 = vector.load %arg1[%3, %c0_1] : memref<50x128xf32, #tpu.memory_space<vmem>>, vector<1x128xf32>
    %c0_2 = arith.constant 0 : index
    %c0_3 = arith.constant 0 : index
    %5 = vector.load %arg8[%c0_2, %c0_3] : memref<16x128xf32, #tpu.memory_space<vmem>>, vector<1x128xf32>
    tpu.vector_store %arg8[%c0_2, %c0_3], %4 {strides = array<i32>} : memref<16x128xf32, #tpu.memory_space<vmem>>, vector<1x128xf32>,
    %c1 = arith.constant 1 : index
    %c0_4 = arith.constant 0 : index
    %6 = memref.load %arg0[%c1, %c0_4] : memref<2x8xi32, #tpu.memory_space<smem>>
    %c0_i32_5 = arith.constant 0 : i32
    %7 = arith.maxsi %6, %c0_i32_5 : i32
    %c49_i32_6 = arith.constant 49 : i32
    %8 = arith.minsi %7, %c49_i32_6 : i32
    %9 = arith.index_cast %8 : i32 to index
    %c0_7 = arith.constant 0 : index
    %10 = vector.load %arg1[%9, %c0_7] : memref<50x128xf32, #tpu.memory_space<vmem>>, vector<1x128xf32>
    %c1_8 = arith.constant 1 : index
    %c0_9 = arith.constant 0 : index
    %11 = vector.load %arg8[%c1_8, %c0_9] : memref<16x128xf32, #tpu.memory_space<vmem>>, vector<1x128xf32>
    tpu.vector_store %arg8[%c1_8, %c0_9], %10 {strides = array<i32>} : memref<16x128xf32, #tpu.memory_space<vmem>>, vector<1x128xf32>,
    %c0_10 = arith.constant 0 : index
    %c1_11 = arith.constant 1 : index
    %12 = memref.load %arg0[%c0_10, %c1_11] : memref<2x8xi32, #tpu.memory_space<smem>>
    %c0_i32_12 = arith.constant 0 : i32
    %13 = arith.maxsi %12, %c0_i32_12 : i32
    %c49_i32_13 = arith.constant 49 : i32
    %14 = arith.minsi %13, %c49_i32_13 : i32
    %15 = arith.index_cast %14 : i32 to index
    %c0_14 = arith.constant 0 : index
    %16 = vector.load %arg1[%15, %c0_14] : memref<50x128xf32, #tpu.memory_space<vmem>>, vector<1x128xf32>
    %c2 = arith.constant 2 : index
    %c0_15 = arith.constant 0 : index
    %17 = vector.load %arg8[%c2, %c0_15] : memref<16x128xf32, #tpu.memory_space<vmem>>, vector<1x128xf32>
    tpu.vector_store %arg8[%c2, %c0_15], %16 {strides = array<i32>} : memref<16x128xf32, #tpu.memory_space<vmem>>, vector<1x128xf32>,
    %c1_16 = arith.constant 1 : index
    %c1_17 = arith.constant 1 : index
    %18 = memref.load %arg0[%c1_16, %c1_17] : memref<2x8xi32, #tpu.memory_space<smem>>
    %c0_i32_18 = arith.constant 0 : i32
    %19 = arith.maxsi %18, %c0_i32_18 : i32
    %c49_i32_19 = arith.constant 49 : i32
    %20 = arith.minsi %19, %c49_i32_19 : i32
    %21 = arith.index_cast %20 : i32 to index
    %c0_20 = arith.constant 0 : index
    %22 = vector.load %arg1[%21, %c0_20] : memref<50x128xf32, #tpu.memory_space<vmem>>, vector<1x128xf32>
    %c3 = arith.constant 3 : index
    %c0_21 = arith.constant 0 : index
    %23 = vector.load %arg8[%c3, %c0_21] : memref<16x128xf32, #tpu.memory_space<vmem>>, vector<1x128xf32>
    tpu.vector_store %arg8[%c3, %c0_21], %22 {strides = array<i32>} : memref<16x128xf32, #tpu.memory_space<vmem>>, vector<1x128xf32>,
    %c0_22 = arith.constant 0 : index
    %c2_23 = arith.constant 2 : index
    %24 = memref.load %arg0[%c0_22, %c2_23] : memref<2x8xi32, #tpu.memory_space<smem>>
    %c0_i32_24 = arith.constant 0 : i32
    %25 = arith.maxsi %24, %c0_i32_24 : i32
    %c49_i32_25 = arith.constant 49 : i32
    %26 = arith.minsi %25, %c49_i32_25 : i32
    %27 = arith.index_cast %26 : i32 to index
    %c0_26 = arith.constant 0 : index
    %28 = vector.load %arg1[%27, %c0_26] : memref<50x128xf32, #tpu.memory_space<vmem>>, vector<1x128xf32>
    %c4 = arith.constant 4 : index
    %c0_27 = arith.constant 0 : index
    %29 = vector.load %arg8[%c4, %c0_27] : memref<16x128xf32, #tpu.memory_space<vmem>>, vector<1x128xf32>
    tpu.vector_store %arg8[%c4, %c0_27], %28 {strides = array<i32>} : memref<16x128xf32, #tpu.memory_space<vmem>>, vector<1x128xf32>,
    %c1_28 = arith.constant 1 : index
    %c2_29 = arith.constant 2 : index
    %30 = memref.load %arg0[%c1_28, %c2_29] : memref<2x8xi32, #tpu.memory_space<smem>>
    %c0_i32_30 = arith.constant 0 : i32
    %31 = arith.maxsi %30, %c0_i32_30 : i32
    %c49_i32_31 = arith.constant 49 : i32
    %32 = arith.minsi %31, %c49_i32_31 : i32
    %33 = arith.index_cast %32 : i32 to index
    %c0_32 = arith.constant 0 : index
    %34 = vector.load %arg1[%33, %c0_32] : memref<50x128xf32, #tpu.memory_space<vmem>>, vector<1x128xf32>
    %c5 = arith.constant 5 : index
    %c0_33 = arith.constant 0 : index
    %35 = vector.load %arg8[%c5, %c0_33] : memref<16x128xf32, #tpu.memory_space<vmem>>, vector<1x128xf32>
    tpu.vector_store %arg8[%c5, %c0_33], %34 {strides = array<i32>} : memref<16x128xf32, #tpu.memory_space<vmem>>, vector<1x128xf32>,
    %c0_34 = arith.constant 0 : index
    %c3_35 = arith.constant 3 : index
    %36 = memref.load %arg0[%c0_34, %c3_35] : memref<2x8xi32, #tpu.memory_space<smem>>
    %c0_i32_36 = arith.constant 0 : i32
    %37 = arith.maxsi %36, %c0_i32_36 : i32
    %c49_i32_37 = arith.constant 49 : i32
    %38 = arith.minsi %37, %c49_i32_37 : i32
    %39 = arith.index_cast %38 : i32 to index
    %c0_38 = arith.constant 0 : index
    %40 = vector.load %arg1[%39, %c0_38] : memref<50x128xf32, #tpu.memory_space<vmem>>, vector<1x128xf32>
    %c6 = arith.constant 6 : index
    %c0_39 = arith.constant 0 : index
    %41 = vector.load %arg8[%c6, %c0_39] : memref<16x128xf32, #tpu.memory_space<vmem>>, vector<1x128xf32>
    tpu.vector_store %arg8[%c6, %c0_39], %40 {strides = array<i32>} : memref<16x128xf32, #tpu.memory_space<vmem>>, vector<1x128xf32>,
    %c1_40 = arith.constant 1 : index
    %c3_41 = arith.constant 3 : index
    %42 = memref.load %arg0[%c1_40, %c3_41] : memref<2x8xi32, #tpu.memory_space<smem>>
    %c0_i32_42 = arith.constant 0 : i32
    %43 = arith.maxsi %42, %c0_i32_42 : i32
    %c49_i32_43 = arith.constant 49 : i32
    %44 = arith.minsi %43, %c49_i32_43 : i32
    %45 = arith.index_cast %44 : i32 to index
    %c0_44 = arith.constant 0 : index
    %46 = vector.load %arg1[%45, %c0_44] : memref<50x128xf32, #tpu.memory_space<vmem>>, vector<1x128xf32>
    %c7 = arith.constant 7 : index
    %c0_45 = arith.constant 0 : index
    %47 = vector.load %arg8[%c7, %c0_45] : memref<16x128xf32, #tpu.memory_space<vmem>>, vector<1x128xf32>
    tpu.vector_store %arg8[%c7, %c0_45], %46 {strides = array<i32>} : memref<16x128xf32, #tpu.memory_space<vmem>>, vector<1x128xf32>,
    %c0_46 = arith.constant 0 : index
    %c4_47 = arith.constant 4 : index
    %48 = memref.load %arg0[%c0_46, %c4_47] : memref<2x8xi32, #tpu.memory_space<smem>>
    %c0_i32_48 = arith.constant 0 : i32
    %49 = arith.maxsi %48, %c0_i32_48 : i32
    %c49_i32_49 = arith.constant 49 : i32
    %50 = arith.minsi %49, %c49_i32_49 : i32
    %51 = arith.index_cast %50 : i32 to index
    %c0_50 = arith.constant 0 : index
    %52 = vector.load %arg1[%51, %c0_50] : memref<50x128xf32, #tpu.memory_space<vmem>>, vector<1x128xf32>
    %c8 = arith.constant 8 : index
    %c0_51 = arith.constant 0 : index
    %53 = vector.load %arg8[%c8, %c0_51] : memref<16x128xf32, #tpu.memory_space<vmem>>, vector<1x128xf32>
    tpu.vector_store %arg8[%c8, %c0_51], %52 {strides = array<i32>} : memref<16x128xf32, #tpu.memory_space<vmem>>, vector<1x128xf32>,
    %c1_52 = arith.constant 1 : index
    %c4_53 = arith.constant 4 : index
    %54 = memref.load %arg0[%c1_52, %c4_53] : memref<2x8xi32, #tpu.memory_space<smem>>
    %c0_i32_54 = arith.constant 0 : i32
    %55 = arith.maxsi %54, %c0_i32_54 : i32
    %c49_i32_55 = arith.constant 49 : i32
    %56 = arith.minsi %55, %c49_i32_55 : i32
    %57 = arith.index_cast %56 : i32 to index
    %c0_56 = arith.constant 0 : index
    %58 = vector.load %arg1[%57, %c0_56] : memref<50x128xf32, #tpu.memory_space<vmem>>, vector<1x128xf32>
    %c9 = arith.constant 9 : index
    %c0_57 = arith.constant 0 : index
    %59 = vector.load %arg8[%c9, %c0_57] : memref<16x128xf32, #tpu.memory_space<vmem>>, vector<1x128xf32>
    tpu.vector_store %arg8[%c9, %c0_57], %58 {strides = array<i32>} : memref<16x128xf32, #tpu.memory_space<vmem>>, vector<1x128xf32>,
    %c0_58 = arith.constant 0 : index
    %c5_59 = arith.constant 5 : index
    %60 = memref.load %arg0[%c0_58, %c5_59] : memref<2x8xi32, #tpu.memory_space<smem>>
    %c0_i32_60 = arith.constant 0 : i32
    %61 = arith.maxsi %60, %c0_i32_60 : i32
    %c49_i32_61 = arith.constant 49 : i32
    %62 = arith.minsi %61, %c49_i32_61 : i32
    %63 = arith.index_cast %62 : i32 to index
    %c0_62 = arith.constant 0 : index
    %64 = vector.load %arg1[%63, %c0_62] : memref<50x128xf32, #tpu.memory_space<vmem>>, vector<1x128xf32>
    %c10 = arith.constant 10 : index
    %c0_63 = arith.constant 0 : index
    %65 = vector.load %arg8[%c10, %c0_63] : memref<16x128xf32, #tpu.memory_space<vmem>>, vector<1x128xf32>
    tpu.vector_store %arg8[%c10, %c0_63], %64 {strides = array<i32>} : memref<16x128xf32, #tpu.memory_space<vmem>>, vector<1x128xf32>,
    %c1_64 = arith.constant 1 : index
    %c5_65 = arith.constant 5 : index
    %66 = memref.load %arg0[%c1_64, %c5_65] : memref<2x8xi32, #tpu.memory_space<smem>>
    %c0_i32_66 = arith.constant 0 : i32
    %67 = arith.maxsi %66, %c0_i32_66 : i32
    %c49_i32_67 = arith.constant 49 : i32
    %68 = arith.minsi %67, %c49_i32_67 : i32
    %69 = arith.index_cast %68 : i32 to index
    %c0_68 = arith.constant 0 : index
    %70 = vector.load %arg1[%69, %c0_68] : memref<50x128xf32, #tpu.memory_space<vmem>>, vector<1x128xf32>
    %c11 = arith.constant 11 : index
    %c0_69 = arith.constant 0 : index
    %71 = vector.load %arg8[%c11, %c0_69] : memref<16x128xf32, #tpu.memory_space<vmem>>, vector<1x128xf32>
    tpu.vector_store %arg8[%c11, %c0_69], %70 {strides = array<i32>} : memref<16x128xf32, #tpu.memory_space<vmem>>, vector<1x128xf32>,
    %c0_70 = arith.constant 0 : index
    %c6_71 = arith.constant 6 : index
    %72 = memref.load %arg0[%c0_70, %c6_71] : memref<2x8xi32, #tpu.memory_space<smem>>
    %c0_i32_72 = arith.constant 0 : i32
    %73 = arith.maxsi %72, %c0_i32_72 : i32
    %c49_i32_73 = arith.constant 49 : i32
    %74 = arith.minsi %73, %c49_i32_73 : i32
    %75 = arith.index_cast %74 : i32 to index
    %c0_74 = arith.constant 0 : index
    %76 = vector.load %arg1[%75, %c0_74] : memref<50x128xf32, #tpu.memory_space<vmem>>, vector<1x128xf32>
    %c12 = arith.constant 12 : index
    %c0_75 = arith.constant 0 : index
    %77 = vector.load %arg8[%c12, %c0_75] : memref<16x128xf32, #tpu.memory_space<vmem>>, vector<1x128xf32>
    tpu.vector_store %arg8[%c12, %c0_75], %76 {strides = array<i32>} : memref<16x128xf32, #tpu.memory_space<vmem>>, vector<1x128xf32>,
    %c1_76 = arith.constant 1 : index
    %c6_77 = arith.constant 6 : index
    %78 = memref.load %arg0[%c1_76, %c6_77] : memref<2x8xi32, #tpu.memory_space<smem>>
    %c0_i32_78 = arith.constant 0 : i32
    %79 = arith.maxsi %78, %c0_i32_78 : i32
    %c49_i32_79 = arith.constant 49 : i32
    %80 = arith.minsi %79, %c49_i32_79 : i32
    %81 = arith.index_cast %80 : i32 to index
    %c0_80 = arith.constant 0 : index
    %82 = vector.load %arg1[%81, %c0_80] : memref<50x128xf32, #tpu.memory_space<vmem>>, vector<1x128xf32>
    %c13 = arith.constant 13 : index
    %c0_81 = arith.constant 0 : index
    %83 = vector.load %arg8[%c13, %c0_81] : memref<16x128xf32, #tpu.memory_space<vmem>>, vector<1x128xf32>
    tpu.vector_store %arg8[%c13, %c0_81], %82 {strides = array<i32>} : memref<16x128xf32, #tpu.memory_space<vmem>>, vector<1x128xf32>,
    %c0_82 = arith.constant 0 : index
    %c7_83 = arith.constant 7 : index
    %84 = memref.load %arg0[%c0_82, %c7_83] : memref<2x8xi32, #tpu.memory_space<smem>>
    %c0_i32_84 = arith.constant 0 : i32
    %85 = arith.maxsi %84, %c0_i32_84 : i32
    %c49_i32_85 = arith.constant 49 : i32
    %86 = arith.minsi %85, %c49_i32_85 : i32
    %87 = arith.index_cast %86 : i32 to index
    %c0_86 = arith.constant 0 : index
    %88 = vector.load %arg1[%87, %c0_86] : memref<50x128xf32, #tpu.memory_space<vmem>>, vector<1x128xf32>
    %c14 = arith.constant 14 : index
    %c0_87 = arith.constant 0 : index
    %89 = vector.load %arg8[%c14, %c0_87] : memref<16x128xf32, #tpu.memory_space<vmem>>, vector<1x128xf32>
    tpu.vector_store %arg8[%c14, %c0_87], %88 {strides = array<i32>} : memref<16x128xf32, #tpu.memory_space<vmem>>, vector<1x128xf32>,
    %c1_88 = arith.constant 1 : index
    %c7_89 = arith.constant 7 : index
    %90 = memref.load %arg0[%c1_88, %c7_89] : memref<2x8xi32, #tpu.memory_space<smem>>
    %c0_i32_90 = arith.constant 0 : i32
    %91 = arith.maxsi %90, %c0_i32_90 : i32
    %c49_i32_91 = arith.constant 49 : i32
    %92 = arith.minsi %91, %c49_i32_91 : i32
    %93 = arith.index_cast %92 : i32 to index
    %c0_92 = arith.constant 0 : index
    %94 = vector.load %arg1[%93, %c0_92] : memref<50x128xf32, #tpu.memory_space<vmem>>, vector<1x128xf32>
    %c15 = arith.constant 15 : index
    %c0_93 = arith.constant 0 : index
    %95 = vector.load %arg8[%c15, %c0_93] : memref<16x128xf32, #tpu.memory_space<vmem>>, vector<1x128xf32>
    tpu.vector_store %arg8[%c15, %c0_93], %94 {strides = array<i32>} : memref<16x128xf32, #tpu.memory_space<vmem>>, vector<1x128xf32>,
    %c0_94 = arith.constant 0 : index
    %c0_95 = arith.constant 0 : index
    %96 = vector.load %arg8[%c0_94, %c0_95] : memref<16x128xf32, #tpu.memory_space<vmem>>, vector<16x128xf32>
    %c0_96 = arith.constant 0 : index
    %c0_97 = arith.constant 0 : index
    %97 = vector.load %arg2[%c0_96, %c0_97] : memref<128x512xf32, #tpu.memory_space<vmem>>, vector<128x512xf32>
    %cst = arith.constant dense<0.000000e+00> : vector<16x512xf32>
    %98 = tpu.matmul %96, %97, %cst {dimension_numbers = #tpu.dot_dimension_numbers<[1], [0], [0], [1], [0, 0, 1, 1], [], []>} : vector<16x128xf32>, vector<128x512xf32>, vector<16x512xf32> -> vector<16x512xf32>
    %c0_98 = arith.constant 0 : index
    %c0_99 = arith.constant 0 : index
    %99 = vector.load %arg4[%c0_98, %c0_99] : memref<1x512xf32, #tpu.memory_space<vmem>>, vector<1x512xf32>
    %100 = vector.broadcast %99 : vector<1x512xf32> to vector<16x512xf32>
    %101 = arith.addf %98, %100 : vector<16x512xf32>
    %c0_100 = arith.constant 0 : index
    %c0_101 = arith.constant 0 : index
    %102 = vector.load %arg9[%c0_100, %c0_101] : memref<16x512xf32, #tpu.memory_space<vmem>>, vector<16x512xf32>
    tpu.vector_store %arg9[%c0_100, %c0_101], %101 {strides = array<i32>} : memref<16x512xf32, #tpu.memory_space<vmem>>, vector<16x512xf32>,
    %c0_102 = arith.constant 0 : index
    %c0_103 = arith.constant 0 : index
    %103 = vector.load %arg3[%c0_102, %c0_103] : memref<128x512xf32, #tpu.memory_space<vmem>>, vector<128x512xf32>
    %cst_104 = arith.constant 0.000000e+00 : f32
    %104 = vector.broadcast %cst_104 : f32 to vector<2x128xf32>
    %cst_105 = arith.constant 0.000000e+00 : f32
    %105 = vector.broadcast %cst_105 : f32 to vector<2x128xf32>
    %c0_106 = arith.constant 0 : index
    %c0_107 = arith.constant 0 : index
    %106 = vector.load %arg9[%c0_106, %c0_107] : memref<16x512xf32, #tpu.memory_space<vmem>>, vector<2x512xf32>
    %cst_108 = arith.constant dense<0.000000e+00> : vector<2x512xf32>
    %107 = tpu.matmul %104, %103, %cst_108 {dimension_numbers = #tpu.dot_dimension_numbers<[1], [0], [0], [1], [0, 0, 1, 1], [], []>} : vector<2x128xf32>, vector<128x512xf32>, vector<2x512xf32> -> vector<2x512xf32>
    %108 = arith.addf %106, %107 : vector<2x512xf32>
    %109 = vector.extract_strided_slice %108 {offsets = [0, 0], sizes = [2, 384], strides = [1, 1]} : vector<2x512xf32> to vector<2x384xf32>
    %110 = arith.negf %109 : vector<2x384xf32>
    %111 = math.exp %110 : vector<2x384xf32>
    %cst_109 = arith.constant 1.000000e+00 : f32
    %112 = vector.broadcast %cst_109 : f32 to vector<2x384xf32>
    %113 = arith.addf %112, %111 : vector<2x384xf32>
    %114 = arith.divf %112, %113 : vector<2x384xf32>
    %115 = vector.extract_strided_slice %108 {offsets = [0, 384], sizes = [2, 128], strides = [1, 1]} : vector<2x512xf32> to vector<2x128xf32>
    %116 = math.tanh %115 : vector<2x128xf32>
    %117 = vector.extract_strided_slice %114 {offsets = [0, 128], sizes = [2, 128], strides = [1, 1]} : vector<2x384xf32> to vector<2x128xf32>
    %118 = arith.mulf %117, %105 : vector<2x128xf32>
    %119 = vector.extract_strided_slice %114 {offsets = [0, 0], sizes = [2, 128], strides = [1, 1]} : vector<2x384xf32> to vector<2x128xf32>
    %120 = arith.mulf %119, %116 : vector<2x128xf32>
    %121 = arith.addf %118, %120 : vector<2x128xf32>
    %122 = vector.extract_strided_slice %114 {offsets = [0, 256], sizes = [2, 128], strides = [1, 1]} : vector<2x384xf32> to vector<2x128xf32>
    %123 = math.tanh %121 : vector<2x128xf32>
    %124 = arith.mulf %122, %123 : vector<2x128xf32>
    %c0_110 = arith.constant 0 : index
    %c0_111 = arith.constant 0 : index
    %125 = vector.load %arg10[%c0_110, %c0_111] : memref<16x128xf32, #tpu.memory_space<vmem>>, vector<2x128xf32>
    tpu.vector_store %arg10[%c0_110, %c0_111], %124 {strides = array<i32>} : memref<16x128xf32, #tpu.memory_space<vmem>>, vector<2x128xf32>,
    %c2_112 = arith.constant 2 : index
    %c0_113 = arith.constant 0 : index
    %126 = vector.load %arg9[%c2_112, %c0_113] : memref<16x512xf32, #tpu.memory_space<vmem>>, vector<2x512xf32>
    %cst_114 = arith.constant dense<0.000000e+00> : vector<2x512xf32>
    %127 = tpu.matmul %124, %103, %cst_114 {dimension_numbers = #tpu.dot_dimension_numbers<[1], [0], [0], [1], [0, 0, 1, 1], [], []>} : vector<2x128xf32>, vector<128x512xf32>, vector<2x512xf32> -> vector<2x512xf32>
    %128 = arith.addf %126, %127 : vector<2x512xf32>
    %129 = vector.extract_strided_slice %128 {offsets = [0, 0], sizes = [2, 384], strides = [1, 1]} : vector<2x512xf32> to vector<2x384xf32>
    %130 = arith.negf %129 : vector<2x384xf32>
    %131 = math.exp %130 : vector<2x384xf32>
    %cst_115 = arith.constant 1.000000e+00 : f32
    %132 = vector.broadcast %cst_115 : f32 to vector<2x384xf32>
    %133 = arith.addf %132, %131 : vector<2x384xf32>
    %134 = arith.divf %132, %133 : vector<2x384xf32>
    %135 = vector.extract_strided_slice %128 {offsets = [0, 384], sizes = [2, 128], strides = [1, 1]} : vector<2x512xf32> to vector<2x128xf32>
    %136 = math.tanh %135 : vector<2x128xf32>
    %137 = vector.extract_strided_slice %134 {offsets = [0, 128], sizes = [2, 128], strides = [1, 1]} : vector<2x384xf32> to vector<2x128xf32>
    %138 = arith.mulf %137, %121 : vector<2x128xf32>
    %139 = vector.extract_strided_slice %134 {offsets = [0, 0], sizes = [2, 128], strides = [1, 1]} : vector<2x384xf32> to vector<2x128xf32>
    %140 = arith.mulf %139, %136 : vector<2x128xf32>
    %141 = arith.addf %138, %140 : vector<2x128xf32>
    %142 = vector.extract_strided_slice %134 {offsets = [0, 256], sizes = [2, 128], strides = [1, 1]} : vector<2x384xf32> to vector<2x128xf32>
    %143 = math.tanh %141 : vector<2x128xf32>
    %144 = arith.mulf %142, %143 : vector<2x128xf32>
    %c2_116 = arith.constant 2 : index
    %c0_117 = arith.constant 0 : index
    %145 = vector.load %arg10[%c2_116, %c0_117] : memref<16x128xf32, #tpu.memory_space<vmem>>, vector<2x128xf32>
    tpu.vector_store %arg10[%c2_116, %c0_117], %144 {strides = array<i32>} : memref<16x128xf32, #tpu.memory_space<vmem>>, vector<2x128xf32>,
    %c4_118 = arith.constant 4 : index
    %c0_119 = arith.constant 0 : index
    %146 = vector.load %arg9[%c4_118, %c0_119] : memref<16x512xf32, #tpu.memory_space<vmem>>, vector<2x512xf32>
    %cst_120 = arith.constant dense<0.000000e+00> : vector<2x512xf32>
    %147 = tpu.matmul %144, %103, %cst_120 {dimension_numbers = #tpu.dot_dimension_numbers<[1], [0], [0], [1], [0, 0, 1, 1], [], []>} : vector<2x128xf32>, vector<128x512xf32>, vector<2x512xf32> -> vector<2x512xf32>
    %148 = arith.addf %146, %147 : vector<2x512xf32>
    %149 = vector.extract_strided_slice %148 {offsets = [0, 0], sizes = [2, 384], strides = [1, 1]} : vector<2x512xf32> to vector<2x384xf32>
    %150 = arith.negf %149 : vector<2x384xf32>
    %151 = math.exp %150 : vector<2x384xf32>
    %cst_121 = arith.constant 1.000000e+00 : f32
    %152 = vector.broadcast %cst_121 : f32 to vector<2x384xf32>
    %153 = arith.addf %152, %151 : vector<2x384xf32>
    %154 = arith.divf %152, %153 : vector<2x384xf32>
    %155 = vector.extract_strided_slice %148 {offsets = [0, 384], sizes = [2, 128], strides = [1, 1]} : vector<2x512xf32> to vector<2x128xf32>
    %156 = math.tanh %155 : vector<2x128xf32>
    %157 = vector.extract_strided_slice %154 {offsets = [0, 128], sizes = [2, 128], strides = [1, 1]} : vector<2x384xf32> to vector<2x128xf32>
    %158 = arith.mulf %157, %141 : vector<2x128xf32>
    %159 = vector.extract_strided_slice %154 {offsets = [0, 0], sizes = [2, 128], strides = [1, 1]} : vector<2x384xf32> to vector<2x128xf32>
    %160 = arith.mulf %159, %156 : vector<2x128xf32>
    %161 = arith.addf %158, %160 : vector<2x128xf32>
    %162 = vector.extract_strided_slice %154 {offsets = [0, 256], sizes = [2, 128], strides = [1, 1]} : vector<2x384xf32> to vector<2x128xf32>
    %163 = math.tanh %161 : vector<2x128xf32>
    %164 = arith.mulf %162, %163 : vector<2x128xf32>
    %c4_122 = arith.constant 4 : index
    %c0_123 = arith.constant 0 : index
    %165 = vector.load %arg10[%c4_122, %c0_123] : memref<16x128xf32, #tpu.memory_space<vmem>>, vector<2x128xf32>
    tpu.vector_store %arg10[%c4_122, %c0_123], %164 {strides = array<i32>} : memref<16x128xf32, #tpu.memory_space<vmem>>, vector<2x128xf32>,
    %c6_124 = arith.constant 6 : index
    %c0_125 = arith.constant 0 : index
    %166 = vector.load %arg9[%c6_124, %c0_125] : memref<16x512xf32, #tpu.memory_space<vmem>>, vector<2x512xf32>
    %cst_126 = arith.constant dense<0.000000e+00> : vector<2x512xf32>
    %167 = tpu.matmul %164, %103, %cst_126 {dimension_numbers = #tpu.dot_dimension_numbers<[1], [0], [0], [1], [0, 0, 1, 1], [], []>} : vector<2x128xf32>, vector<128x512xf32>, vector<2x512xf32> -> vector<2x512xf32>
    %168 = arith.addf %166, %167 : vector<2x512xf32>
    %169 = vector.extract_strided_slice %168 {offsets = [0, 0], sizes = [2, 384], strides = [1, 1]} : vector<2x512xf32> to vector<2x384xf32>
    %170 = arith.negf %169 : vector<2x384xf32>
    %171 = math.exp %170 : vector<2x384xf32>
    %cst_127 = arith.constant 1.000000e+00 : f32
    %172 = vector.broadcast %cst_127 : f32 to vector<2x384xf32>
    %173 = arith.addf %172, %171 : vector<2x384xf32>
    %174 = arith.divf %172, %173 : vector<2x384xf32>
    %175 = vector.extract_strided_slice %168 {offsets = [0, 384], sizes = [2, 128], strides = [1, 1]} : vector<2x512xf32> to vector<2x128xf32>
    %176 = math.tanh %175 : vector<2x128xf32>
    %177 = vector.extract_strided_slice %174 {offsets = [0, 128], sizes = [2, 128], strides = [1, 1]} : vector<2x384xf32> to vector<2x128xf32>
    %178 = arith.mulf %177, %161 : vector<2x128xf32>
    %179 = vector.extract_strided_slice %174 {offsets = [0, 0], sizes = [2, 128], strides = [1, 1]} : vector<2x384xf32> to vector<2x128xf32>
    %180 = arith.mulf %179, %176 : vector<2x128xf32>
    %181 = arith.addf %178, %180 : vector<2x128xf32>
    %182 = vector.extract_strided_slice %174 {offsets = [0, 256], sizes = [2, 128], strides = [1, 1]} : vector<2x384xf32> to vector<2x128xf32>
    %183 = math.tanh %181 : vector<2x128xf32>
    %184 = arith.mulf %182, %183 : vector<2x128xf32>
    %c6_128 = arith.constant 6 : index
    %c0_129 = arith.constant 0 : index
    %185 = vector.load %arg10[%c6_128, %c0_129] : memref<16x128xf32, #tpu.memory_space<vmem>>, vector<2x128xf32>
    tpu.vector_store %arg10[%c6_128, %c0_129], %184 {strides = array<i32>} : memref<16x128xf32, #tpu.memory_space<vmem>>, vector<2x128xf32>,
    %c8_130 = arith.constant 8 : index
    %c0_131 = arith.constant 0 : index
    %186 = vector.load %arg9[%c8_130, %c0_131] : memref<16x512xf32, #tpu.memory_space<vmem>>, vector<2x512xf32>
    %cst_132 = arith.constant dense<0.000000e+00> : vector<2x512xf32>
    %187 = tpu.matmul %184, %103, %cst_132 {dimension_numbers = #tpu.dot_dimension_numbers<[1], [0], [0], [1], [0, 0, 1, 1], [], []>} : vector<2x128xf32>, vector<128x512xf32>, vector<2x512xf32> -> vector<2x512xf32>
    %188 = arith.addf %186, %187 : vector<2x512xf32>
    %189 = vector.extract_strided_slice %188 {offsets = [0, 0], sizes = [2, 384], strides = [1, 1]} : vector<2x512xf32> to vector<2x384xf32>
    %190 = arith.negf %189 : vector<2x384xf32>
    %191 = math.exp %190 : vector<2x384xf32>
    %cst_133 = arith.constant 1.000000e+00 : f32
    %192 = vector.broadcast %cst_133 : f32 to vector<2x384xf32>
    %193 = arith.addf %192, %191 : vector<2x384xf32>
    %194 = arith.divf %192, %193 : vector<2x384xf32>
    %195 = vector.extract_strided_slice %188 {offsets = [0, 384], sizes = [2, 128], strides = [1, 1]} : vector<2x512xf32> to vector<2x128xf32>
    %196 = math.tanh %195 : vector<2x128xf32>
    %197 = vector.extract_strided_slice %194 {offsets = [0, 128], sizes = [2, 128], strides = [1, 1]} : vector<2x384xf32> to vector<2x128xf32>
    %198 = arith.mulf %197, %181 : vector<2x128xf32>
    %199 = vector.extract_strided_slice %194 {offsets = [0, 0], sizes = [2, 128], strides = [1, 1]} : vector<2x384xf32> to vector<2x128xf32>
    %200 = arith.mulf %199, %196 : vector<2x128xf32>
    %201 = arith.addf %198, %200 : vector<2x128xf32>
    %202 = vector.extract_strided_slice %194 {offsets = [0, 256], sizes = [2, 128], strides = [1, 1]} : vector<2x384xf32> to vector<2x128xf32>
    %203 = math.tanh %201 : vector<2x128xf32>
    %204 = arith.mulf %202, %203 : vector<2x128xf32>
    %c8_134 = arith.constant 8 : index
    %c0_135 = arith.constant 0 : index
    %205 = vector.load %arg10[%c8_134, %c0_135] : memref<16x128xf32, #tpu.memory_space<vmem>>, vector<2x128xf32>
    tpu.vector_store %arg10[%c8_134, %c0_135], %204 {strides = array<i32>} : memref<16x128xf32, #tpu.memory_space<vmem>>, vector<2x128xf32>,
    %c10_136 = arith.constant 10 : index
    %c0_137 = arith.constant 0 : index
    %206 = vector.load %arg9[%c10_136, %c0_137] : memref<16x512xf32, #tpu.memory_space<vmem>>, vector<2x512xf32>
    %cst_138 = arith.constant dense<0.000000e+00> : vector<2x512xf32>
    %207 = tpu.matmul %204, %103, %cst_138 {dimension_numbers = #tpu.dot_dimension_numbers<[1], [0], [0], [1], [0, 0, 1, 1], [], []>} : vector<2x128xf32>, vector<128x512xf32>, vector<2x512xf32> -> vector<2x512xf32>
    %208 = arith.addf %206, %207 : vector<2x512xf32>
    %209 = vector.extract_strided_slice %208 {offsets = [0, 0], sizes = [2, 384], strides = [1, 1]} : vector<2x512xf32> to vector<2x384xf32>
    %210 = arith.negf %209 : vector<2x384xf32>
    %211 = math.exp %210 : vector<2x384xf32>
    %cst_139 = arith.constant 1.000000e+00 : f32
    %212 = vector.broadcast %cst_139 : f32 to vector<2x384xf32>
    %213 = arith.addf %212, %211 : vector<2x384xf32>
    %214 = arith.divf %212, %213 : vector<2x384xf32>
    %215 = vector.extract_strided_slice %208 {offsets = [0, 384], sizes = [2, 128], strides = [1, 1]} : vector<2x512xf32> to vector<2x128xf32>
    %216 = math.tanh %215 : vector<2x128xf32>
    %217 = vector.extract_strided_slice %214 {offsets = [0, 128], sizes = [2, 128], strides = [1, 1]} : vector<2x384xf32> to vector<2x128xf32>
    %218 = arith.mulf %217, %201 : vector<2x128xf32>
    %219 = vector.extract_strided_slice %214 {offsets = [0, 0], sizes = [2, 128], strides = [1, 1]} : vector<2x384xf32> to vector<2x128xf32>
    %220 = arith.mulf %219, %216 : vector<2x128xf32>
    %221 = arith.addf %218, %220 : vector<2x128xf32>
    %222 = vector.extract_strided_slice %214 {offsets = [0, 256], sizes = [2, 128], strides = [1, 1]} : vector<2x384xf32> to vector<2x128xf32>
    %223 = math.tanh %221 : vector<2x128xf32>
    %224 = arith.mulf %222, %223 : vector<2x128xf32>
    %c10_140 = arith.constant 10 : index
    %c0_141 = arith.constant 0 : index
    %225 = vector.load %arg10[%c10_140, %c0_141] : memref<16x128xf32, #tpu.memory_space<vmem>>, vector<2x128xf32>
    tpu.vector_store %arg10[%c10_140, %c0_141], %224 {strides = array<i32>} : memref<16x128xf32, #tpu.memory_space<vmem>>, vector<2x128xf32>,
    %c12_142 = arith.constant 12 : index
    %c0_143 = arith.constant 0 : index
    %226 = vector.load %arg9[%c12_142, %c0_143] : memref<16x512xf32, #tpu.memory_space<vmem>>, vector<2x512xf32>
    %cst_144 = arith.constant dense<0.000000e+00> : vector<2x512xf32>
    %227 = tpu.matmul %224, %103, %cst_144 {dimension_numbers = #tpu.dot_dimension_numbers<[1], [0], [0], [1], [0, 0, 1, 1], [], []>} : vector<2x128xf32>, vector<128x512xf32>, vector<2x512xf32> -> vector<2x512xf32>
    %228 = arith.addf %226, %227 : vector<2x512xf32>
    %229 = vector.extract_strided_slice %228 {offsets = [0, 0], sizes = [2, 384], strides = [1, 1]} : vector<2x512xf32> to vector<2x384xf32>
    %230 = arith.negf %229 : vector<2x384xf32>
    %231 = math.exp %230 : vector<2x384xf32>
    %cst_145 = arith.constant 1.000000e+00 : f32
    %232 = vector.broadcast %cst_145 : f32 to vector<2x384xf32>
    %233 = arith.addf %232, %231 : vector<2x384xf32>
    %234 = arith.divf %232, %233 : vector<2x384xf32>
    %235 = vector.extract_strided_slice %228 {offsets = [0, 384], sizes = [2, 128], strides = [1, 1]} : vector<2x512xf32> to vector<2x128xf32>
    %236 = math.tanh %235 : vector<2x128xf32>
    %237 = vector.extract_strided_slice %234 {offsets = [0, 128], sizes = [2, 128], strides = [1, 1]} : vector<2x384xf32> to vector<2x128xf32>
    %238 = arith.mulf %237, %221 : vector<2x128xf32>
    %239 = vector.extract_strided_slice %234 {offsets = [0, 0], sizes = [2, 128], strides = [1, 1]} : vector<2x384xf32> to vector<2x128xf32>
    %240 = arith.mulf %239, %236 : vector<2x128xf32>
    %241 = arith.addf %238, %240 : vector<2x128xf32>
    %242 = vector.extract_strided_slice %234 {offsets = [0, 256], sizes = [2, 128], strides = [1, 1]} : vector<2x384xf32> to vector<2x128xf32>
    %243 = math.tanh %241 : vector<2x128xf32>
    %244 = arith.mulf %242, %243 : vector<2x128xf32>
    %c12_146 = arith.constant 12 : index
    %c0_147 = arith.constant 0 : index
    %245 = vector.load %arg10[%c12_146, %c0_147] : memref<16x128xf32, #tpu.memory_space<vmem>>, vector<2x128xf32>
    tpu.vector_store %arg10[%c12_146, %c0_147], %244 {strides = array<i32>} : memref<16x128xf32, #tpu.memory_space<vmem>>, vector<2x128xf32>,
    %c14_148 = arith.constant 14 : index
    %c0_149 = arith.constant 0 : index
    %246 = vector.load %arg9[%c14_148, %c0_149] : memref<16x512xf32, #tpu.memory_space<vmem>>, vector<2x512xf32>
    %cst_150 = arith.constant dense<0.000000e+00> : vector<2x512xf32>
    %247 = tpu.matmul %244, %103, %cst_150 {dimension_numbers = #tpu.dot_dimension_numbers<[1], [0], [0], [1], [0, 0, 1, 1], [], []>} : vector<2x128xf32>, vector<128x512xf32>, vector<2x512xf32> -> vector<2x512xf32>
    %248 = arith.addf %246, %247 : vector<2x512xf32>
    %249 = vector.extract_strided_slice %248 {offsets = [0, 0], sizes = [2, 384], strides = [1, 1]} : vector<2x512xf32> to vector<2x384xf32>
    %250 = arith.negf %249 : vector<2x384xf32>
    %251 = math.exp %250 : vector<2x384xf32>
    %cst_151 = arith.constant 1.000000e+00 : f32
    %252 = vector.broadcast %cst_151 : f32 to vector<2x384xf32>
    %253 = arith.addf %252, %251 : vector<2x384xf32>
    %254 = arith.divf %252, %253 : vector<2x384xf32>
    %255 = vector.extract_strided_slice %248 {offsets = [0, 384], sizes = [2, 128], strides = [1, 1]} : vector<2x512xf32> to vector<2x128xf32>
    %256 = math.tanh %255 : vector<2x128xf32>
    %257 = vector.extract_strided_slice %254 {offsets = [0, 128], sizes = [2, 128], strides = [1, 1]} : vector<2x384xf32> to vector<2x128xf32>
    %258 = arith.mulf %257, %241 : vector<2x128xf32>
    %259 = vector.extract_strided_slice %254 {offsets = [0, 0], sizes = [2, 128], strides = [1, 1]} : vector<2x384xf32> to vector<2x128xf32>
    %260 = arith.mulf %259, %256 : vector<2x128xf32>
    %261 = arith.addf %258, %260 : vector<2x128xf32>
    %262 = vector.extract_strided_slice %254 {offsets = [0, 256], sizes = [2, 128], strides = [1, 1]} : vector<2x384xf32> to vector<2x128xf32>
    %263 = math.tanh %261 : vector<2x128xf32>
    %264 = arith.mulf %262, %263 : vector<2x128xf32>
    %c14_152 = arith.constant 14 : index
    %c0_153 = arith.constant 0 : index
    %265 = vector.load %arg10[%c14_152, %c0_153] : memref<16x128xf32, #tpu.memory_space<vmem>>, vector<2x128xf32>
    tpu.vector_store %arg10[%c14_152, %c0_153], %264 {strides = array<i32>} : memref<16x128xf32, #tpu.memory_space<vmem>>, vector<2x128xf32>,
    %c0_154 = arith.constant 0 : index
    %c0_155 = arith.constant 0 : index
    %266 = vector.load %arg10[%c0_154, %c0_155] : memref<16x128xf32, #tpu.memory_space<vmem>>, vector<16x128xf32>
    %c0_156 = arith.constant 0 : index
    %c0_157 = arith.constant 0 : index
    %267 = vector.load %arg5[%c0_156, %c0_157] : memref<128x8xf32, #tpu.memory_space<vmem>>, vector<128x8xf32>
    %cst_158 = arith.constant dense<0.000000e+00> : vector<16x8xf32>
    %268 = tpu.matmul %266, %267, %cst_158 {dimension_numbers = #tpu.dot_dimension_numbers<[1], [0], [0], [1], [0, 0, 1, 1], [], []>} : vector<16x128xf32>, vector<128x8xf32>, vector<16x8xf32> -> vector<16x8xf32>
    %c0_159 = arith.constant 0 : index
    %c0_160 = arith.constant 0 : index
    %269 = vector.load %arg6[%c0_159, %c0_160] : memref<1x8xf32, #tpu.memory_space<vmem>>, vector<1x8xf32>
    %270 = vector.broadcast %269 : vector<1x8xf32> to vector<16x8xf32>
    %271 = arith.addf %268, %270 : vector<16x8xf32>
    %cst_161 = arith.constant dense<0xFF800000> : vector<16xf32>
    %272 = vector.multi_reduction <maximumf>, %271, %cst_161 [1] : vector<16x8xf32> to vector<16xf32>
    %273 = vector.shape_cast %272 : vector<16xf32> to vector<16x1xf32>
    %274 = vector.broadcast %273 : vector<16x1xf32> to vector<16x8xf32>
    %275 = arith.subf %271, %274 : vector<16x8xf32>
    %276 = math.exp %275 : vector<16x8xf32>
    %cst_162 = arith.constant dense<0.000000e+00> : vector<16xf32>
    %277 = vector.multi_reduction <add>, %276, %cst_162 [1] : vector<16x8xf32> to vector<16xf32>
    %278 = vector.shape_cast %277 : vector<16xf32> to vector<16x1xf32>
    %279 = math.log %278 : vector<16x1xf32>
    %280 = vector.broadcast %279 : vector<16x1xf32> to vector<16x8xf32>
    %281 = arith.subf %275, %280 : vector<16x8xf32>
    %c0_163 = arith.constant 0 : index
    %c0_164 = arith.constant 0 : index
    %282 = vector.load %arg7[%c0_163, %c0_164] : memref<16x8xf32, #tpu.memory_space<vmem>>, vector<16x8xf32>
    tpu.vector_store %arg7[%c0_163, %c0_164], %281 {strides = array<i32>} : memref<16x8xf32, #tpu.memory_space<vmem>>, vector<16x8xf32>,
    return
  }
}

</mosaic_0001>

<bundles_post_ra>
// kernel: net_forward.1
= control target key start
LH: loop header
LB: loop body
LE: loop exit
PB: predicated region body
PF: predicated region fallthrough
CT: control target
= control target key end

     0   :  { %12 = vsyncpa [#allocation7], 0  ;;  %s3744_s0 = inlined_call_operand.vmem [shape: s32[2,8], index: 0, kind: input, shape index: {}]   ;;  %s3745_s1 = inlined_call_operand.vmem [shape: f32[50,128], index: 1, kind: input, shape index: {}]   ;;  %s3746_s2 = inlined_call_operand.hbm [shape: f32[128,512], index: 2, kind: input, shape index: {}]   ;;  %s3747_s3 = inlined_call_operand.hbm [shape: f32[128,512], index: 3, kind: input, shape index: {}]   ;;  %s3748_s4 = inlined_call_operand.vmem [shape: f32[1,512], index: 4, kind: input, shape index: {}]   ;;  %s3749_s5 = inlined_call_operand.vmem [shape: f32[128,8], index: 5, kind: input, shape index: {}]   ;;  %s3750_s6 = inlined_call_operand.vmem [shape: f32[1,8], index: 6, kind: input, shape index: {}]   ;;  %s3751_s7 = inlined_call_operand.vmem [shape: f32[16,8], index: 7, kind: output, shape index: {}]  }
   0x1   :  { %13 = vsyncpa [#allocation6], 0  ;;  %s21_s26 = sshll.u32 %s3744_s0, 4  ;;  %s22_s26 = int_to_ptr.vmem [resolvable:$true] %s21_s26 }
   0x2   :  { %14 = vsyncpa [#allocation10], 0  ;;  %s2578_s27 = scalar_lea.vmem %s22_s26, 32  ;;  %p2583_p1 = scmp.lt.s32.totalorder %s22_s26, %s22_s26 }
   0x3   :  { %p2579_p0 = scmp.ne.s32.totalorder %s22_s26, %s2578_s27  ;;  %p2584_p2 = scmp.lt.s32.totalorder %s2578_s27, %s2578_s27 }
   0x5   :  { %p2585_p3 = por %p2584_p2, %p2583_p1 }
   0x7   :  { %p2586_p4 = pnand %p2585_p3, %p2579_p0 }
   0x9   :  { %2589 = shalt.err (!%p2586_p4)
}
   0xa   :  { %s2636_s28 = smov [#allocation5]   ;;  %s2637_s29 = smov [#allocation8]  }
   0xb   :  { %24 = dma.vmem_to_smem %s22_s26, 32, %s2636_s28, [#allocation7]  }
   0xc   :  { %s32_s30 = sshll.u32 %s2637_s29, 4  ;;  %s33_s30 = int_to_ptr.vmem [resolvable:$true] %s32_s30 }
   0xd   :  { %s2598_s8 = scalar_lea.vmem %s33_s30, 8192  ;;  %p2603_p6 = scmp.lt.s32.totalorder %s33_s30, %s33_s30 }
   0xe   :  { %p2599_p5 = scmp.ne.s32.totalorder %s33_s30, %s2598_s8  ;;  %p2604_p7 = scmp.lt.s32.totalorder %s2598_s8, %s2598_s8 }
  0x10   :  { %p2605_p8 = por %p2604_p7, %p2603_p6 }
  0x12   :  { %p2606_p9 = pnand %p2605_p8, %p2599_p5 }
  0x14   :  { %2609 = shalt.err (!%p2606_p9)
}
  0x15   :  { %s2638_s0 = smov 512   ;;  %s2639_s9 = smov 32  }
  0x16   :  { %38 = dma.hbm_to_vmem [thread:$0]  %s3746_s2, 8192, %s33_s30, [#allocation6], %s2638_s0, %s2638_s0, %s2639_s9  }
  0x17   :  { %s2640_s12 = smov [#allocation9]  }
  0x18   :  { %s44_s13 = sshll.u32 %s2640_s12, 4  ;;  %s45_s13 = int_to_ptr.vmem [resolvable:$true] %s44_s13 }
  0x19   :  { %s2618_s14 = scalar_lea.vmem %s45_s13, 8192  ;;  %p2623_p11 = scmp.lt.s32.totalorder %s45_s13, %s45_s13 }
  0x1a   :  { %p2619_p10 = scmp.ne.s32.totalorder %s45_s13, %s2618_s14  ;;  %p2624_p12 = scmp.lt.s32.totalorder %s2618_s14, %s2618_s14 }
  0x1c   :  { %p2625_p13 = por %p2624_p12, %p2623_p11 }
  0x1e   :  { %p2626_p0 = pnand %p2625_p13, %p2619_p10 }
  0x20   :  { %2629 = shalt.err (!%p2626_p0)
}
  0x21   :  { %50 = dma.hbm_to_vmem [thread:$0]  %s3747_s3, 8192, %s45_s13, [#allocation10], %s2638_s0, %s2638_s0, %s2639_s9  }
  0x22   :  { %2630 = dma.done.wait [#allocation7], 32  }
  0x23   :  { %2631 = vsyncadd [#allocation7], 4294967264 }
  0x24   :  { %2632 = dma.done.wait [#allocation6], 8192  }
  0x25   :  { %2633 = vsyncadd [#allocation6], 4294959104 }
  0x26   :  { %2634 = dma.done.wait [#allocation10], 8192  }
  0x27   :  { %2635 = vsyncadd [#allocation10], 4294959104 }
  0x28   :  { %66 = sfence }
  0x29   :  { %v258_v0 = vld [vmem:[#allocation8 + $0x1e8] sm:$0xff]  ;;  %v260_v1 = vld [vmem:[#allocation8 + $0x1f8] sm:$0xff]  ;;  %v257_v2 = vld [vmem:[#allocation8 + $0x1e0] sm:$0xff]  ;;  %s2691_s2 = sld [smem:[#allocation5]]  ;;  %vm2117_vm0 = vcmask 64512  }
  0x2a   :  { %283 = vmatprep.subr.mxu0 %v258_v0  ;;  %360 = vmatprep.subr.mxu1 %v260_v1  ;;  %v259_v3 = vld [vmem:[#allocation8 + $0x1f0] sm:$0xff]  ;;  %v254_v4 = vld [vmem:[#allocation8 + $0x1c8] sm:$0xff]  ;;  %v256_v5 = vld [vmem:[#allocation8 + $0x1d8] sm:$0xff]  ;;  %s2693_s17 = sld [smem:[#allocation5 + $0x80]] }
  0x2b   :  { %284 = vmatpush1.msra.mxu0 %v257_v2  ;;  %361 = vmatpush1.msra.mxu1 %v259_v3  ;;  %v253_v6 = vld [vmem:[#allocation8 + $0x1c0] sm:$0xff]  ;;  %v255_v7 = vld [vmem:[#allocation8 + $0x1d0] sm:$0xff]  ;;  %v250_v8 = vld [vmem:[#allocation8 + $0x1a8] sm:$0xff]  ;;  %s2695_s3 = sld [smem:[#allocation5 + $0x1]] }
  0x2c   :  { %285 = vmatprep.subr.mxu0 %v254_v4  ;;  %362 = vmatprep.subr.mxu1 %v256_v5  ;;  %v252_v9 = vld [vmem:[#allocation8 + $0x1b8] sm:$0xff]  ;;  %v249_v10 = vld [vmem:[#allocation8 + $0x1a0] sm:$0xff]  ;;  %v251_v11 = vld [vmem:[#allocation8 + $0x1b0] sm:$0xff]  ;;  %s2697_s18 = sld [smem:[#allocation5 + $0x81]] }
  0x2d   :  { %286 = vmatpush1.msra.mxu0 %v253_v6  ;;  %363 = vmatpush1.msra.mxu1 %v255_v7  ;;  %v246_v12 = vld [vmem:[#allocation8 + $0x188] sm:$0xff]  ;;  %v248_v13 = vld [vmem:[#allocation8 + $0x198] sm:$0xff]  ;;  %s2699_s19 = sld [smem:[#allocation5 + $0x2]]  ;;  %v245_v14 = vld [vmem:[#allocation8 + $0x180] sm:$0xff] }
  0x2e   :  { %287 = vmatprep.subr.mxu0 %v250_v8  ;;  %364 = vmatprep.subr.mxu1 %v252_v9  ;;  %v247_v15 = vld [vmem:[#allocation8 + $0x190] sm:$0xff]  ;;  %s2701_s20 = sld [smem:[#allocation5 + $0x82]]  ;;  %v242_v16 = vld [vmem:[#allocation8 + $0x168] sm:$0xff]  ;;  %v244_v17 = vld [vmem:[#allocation8 + $0x178] sm:$0xff]  ;;  %v3754_v8 = vmov 0.0  }
  0x2f   :  { %288 = vmatpush1.msra.mxu0 %v249_v10  ;;  %365 = vmatpush1.msra.mxu1 %v251_v11  ;;  %p68_p1 = scmp.gt.s32.totalorder %s2691_s2, 0  ;;  %p2167_p2 = scmp.lt.s32.totalorder %s2691_s2, 49  ;;  %v241_v18 = vld [vmem:[#allocation8 + $0x160] sm:$0xff]  ;;  %v243_v19 = vld [vmem:[#allocation8 + $0x170] sm:$0xff]  ;;  %v238_v20 = vld [vmem:[#allocation8 + $0x148] sm:$0xff] }
  0x30   :  { %289 = vmatprep.subr.mxu0 %v246_v12  ;;  %366 = vmatprep.subr.mxu1 %v248_v13  ;;  %p76_p3 = scmp.gt.s32.totalorder %s2693_s17, 0  ;;  %p2173_p4 = scmp.lt.s32.totalorder %s2693_s17, 49  ;;  %v240_v21 = vld [vmem:[#allocation8 + $0x158] sm:$0xff]  ;;  %v237_v22 = vld [vmem:[#allocation8 + $0x140] sm:$0xff]  ;;  %v239_v23 = vld [vmem:[#allocation8 + $0x150] sm:$0xff] }
  0x31   :  { %290 = vmatpush1.msra.mxu0 %v245_v14  ;;  %367 = vmatpush1.msra.mxu1 %v247_v15  ;;  %s69_s21 = scalar_select %p68_p1, %s2691_s2, 0  ;;  %v234_v24 = vld [vmem:[#allocation8 + $0x128] sm:$0xff]  ;;  %v236_v25 = vld [vmem:[#allocation8 + $0x138] sm:$0xff]  ;;  %v233_v26 = vld [vmem:[#allocation8 + $0x120] sm:$0xff] }
  0x32   :  { %291 = vmatprep.subr.mxu0 %v242_v16  ;;  %368 = vmatprep.subr.mxu1 %v244_v17  ;;  %s77_s22 = scalar_select %p76_p3, %s2693_s17, 0  ;;  %v235_v27 = vld [vmem:[#allocation8 + $0x130] sm:$0xff]  ;;  %v230_v28 = vld [vmem:[#allocation8 + $0x108] sm:$0xff]  ;;  %v232_v29 = vld [vmem:[#allocation8 + $0x118] sm:$0xff] }
  0x33   :  { %292 = vmatpush1.msra.mxu0 %v241_v18  ;;  %369 = vmatpush1.msra.mxu1 %v243_v19  ;;  %s3978_s21 = smov (!%p2167_p2, %s69_s21), 49  ;;  %p84_p5 = scmp.gt.s32.totalorder %s2695_s3, 0  ;;  %v229_v30 = vld [vmem:[#allocation8 + $0x100] sm:$0xff]  ;;  %v231_v31 = vld [vmem:[#allocation8 + $0x110] sm:$0xff]  ;;  %v226_v32 = vld [vmem:[#allocation8 + $0xe8] sm:$0xff] }
  0x34   :  { %293 = vmatprep.subr.mxu0 %v238_v20  ;;  %370 = vmatprep.subr.mxu1 %v240_v21  ;;  %s3980_s22 = smov (!%p2173_p4, %s77_s22), 49  ;;  %s72_s25 = scalar_lea.vmem %s3745_s1, %s3978_s21  ;;  %v228_v33 = vld [vmem:[#allocation8 + $0xf8] sm:$0xff]  ;;  %v225_v34 = vld [vmem:[#allocation8 + $0xe0] sm:$0xff]  ;;  %v227_v35 = vld [vmem:[#allocation8 + $0xf0] sm:$0xff] }
  0x35   :  { %294 = vmatpush1.msra.mxu0 %v237_v22  ;;  %371 = vmatpush1.msra.mxu1 %v239_v23  ;;  %s80_s28 = scalar_lea.vmem %s3745_s1, %s3980_s22  ;;  %p2179_p6 = scmp.lt.s32.totalorder %s2695_s3, 49  ;;  %v222_v36 = vld [vmem:[#allocation8 + $0xc8] sm:$0xff]  ;;  %v224_v37 = vld [vmem:[#allocation8 + $0xd8] sm:$0xff]  ;;  %v221_v38 = vld [vmem:[#allocation8 + $0xc0] sm:$0xff] }
  0x36   :  { %295 = vmatprep.subr.mxu0 %v234_v24  ;;  %372 = vmatprep.subr.mxu1 %v236_v25  ;;  %s85_s29 = scalar_select %p84_p5, %s2695_s3, 0  ;;  %v223_v39 = vld [vmem:[#allocation8 + $0xd0] sm:$0xff]  ;;  %v218_v40 = vld [vmem:[#allocation8 + $0xa8] sm:$0xff]  ;;  %v220_v41 = vld [vmem:[#allocation8 + $0xb8] sm:$0xff] }
  0x37   :  { %296 = vmatpush1.msra.mxu0 %v233_v26  ;;  %373 = vmatpush1.msra.mxu1 %v235_v27  ;;  %p92_p7 = scmp.gt.s32.totalorder %s2697_s18, 0  ;;  %p2185_p8 = scmp.lt.s32.totalorder %s2697_s18, 49  ;;  %v217_v42 = vld [vmem:[#allocation8 + $0xa0] sm:$0xff]  ;;  %v219_v43 = vld [vmem:[#allocation8 + $0xb0] sm:$0xff]  ;;  %v214_v44 = vld [vmem:[#allocation8 + $0x88] sm:$0xff] }
  0x38   :  { %297 = vmatprep.subr.mxu0 %v230_v28  ;;  %374 = vmatprep.subr.mxu1 %v232_v29  ;;  %s3982_s29 = smov (!%p2179_p6, %s85_s29), 49  ;;  %p100_p9 = scmp.gt.s32.totalorder %s2699_s19, 0  ;;  %v216_v45 = vld [vmem:[#allocation8 + $0x98] sm:$0xff]  ;;  %v213_v46 = vld [vmem:[#allocation8 + $0x80] sm:$0xff]  ;;  %v215_v47 = vld [vmem:[#allocation8 + $0x90] sm:$0xff] }
  0x39   :  { %298 = vmatpush1.msra.mxu0 %v229_v30  ;;  %375 = vmatpush1.msra.mxu1 %v231_v31  ;;  %s93_s30 = scalar_select %p92_p7, %s2697_s18, 0  ;;  %v210_v48 = vld [vmem:[#allocation8 + $0x68] sm:$0xff]  ;;  %v212_v49 = vld [vmem:[#allocation8 + $0x78] sm:$0xff]  ;;  %v73_v50 = vld [vmem:[%s72_s25] sm:$0x1] }
  0x3a   :  { %299 = vmatprep.subr.mxu0 %v226_v32  ;;  %376 = vmatprep.subr.mxu1 %v228_v33  ;;  %s88_s9 = scalar_lea.vmem %s3745_s1, %s3982_s29  ;;  %v81_v51 = vld [vmem:[%s80_s28] sm:$0x1]  ;;  %p2191_p10 = scmp.lt.s32.totalorder %s2699_s19, 49  ;;  %74 = vst [vmem:[#allocation2] sm:$0x1] %v73_v50  ;;  %v211_v55 = vld [vmem:[#allocation8 + $0x70] sm:$0xff] }
  0x3b   :  { %300 = vmatpush1.msra.mxu0 %v225_v34  ;;  %377 = vmatpush1.msra.mxu1 %v227_v35  ;;  %s3984_s30 = smov (!%p2185_p8, %s93_s30), 49  ;;  %82 = vst [vmem:[#allocation2 + $0x1] sm:$0x1] %v81_v51  ;;  %v89_v52 = vld [vmem:[%s88_s9] sm:$0x1]  ;;  %p108_p11 = scmp.gt.s32.totalorder %s2701_s20, 0 }
  0x3c   :  { %301 = vmatprep.subr.mxu0 %v222_v36  ;;  %378 = vmatprep.subr.mxu1 %v224_v37  ;;  %s101_s10 = scalar_select %p100_p9, %s2699_s19, 0  ;;  %v209_v54 = vld [vmem:[#allocation8 + $0x60] sm:$0xff]  ;;  %90 = vst [vmem:[#allocation2 + $0x2] sm:$0x1] %v89_v52  ;;  %v206_v56 = vld [vmem:[#allocation8 + $0x48] sm:$0xff]  ;;  %v208_v57 = vld [vmem:[#allocation8 + $0x58] sm:$0xff] }
  0x3d   :  { %302 = vmatpush1.msra.mxu0 %v221_v38  ;;  %379 = vmatpush1.msra.mxu1 %v223_v39  ;;  %s96_s2 = scalar_lea.vmem %s3745_s1, %s3984_s30  ;;  %p2197_p12 = scmp.lt.s32.totalorder %s2701_s20, 49  ;;  %v205_v58 = vld [vmem:[#allocation8 + $0x40] sm:$0xff]  ;;  %v207_v59 = vld [vmem:[#allocation8 + $0x50] sm:$0xff]  ;;  %v202_v60 = vld [vmem:[#allocation8 + $0x28] sm:$0xff] }
  0x3e   :  { %303 = vmatprep.subr.mxu0 %v218_v40  ;;  %380 = vmatprep.subr.mxu1 %v220_v41  ;;  %v97_v53 = vld [vmem:[%s96_s2] sm:$0x1]  ;;  %s3986_s10 = smov (!%p2191_p10, %s101_s10), 49  ;;  %s2765_s22 = sld [smem:[#allocation5 + $0x3]]  ;;  %v204_v61 = vld [vmem:[#allocation8 + $0x38] sm:$0xff]  ;;  %v203_v0 = vld [vmem:[#allocation8 + $0x30] sm:$0xff] }
  0x3f   :  { %304 = vmatpush1.msra.mxu0 %v217_v42  ;;  %381 = vmatpush1.msra.mxu1 %v219_v43  ;;  %98 = vst [vmem:[#allocation2 + $0x3] sm:$0x1] %v97_v53  ;;  %s109_s17 = scalar_select %p108_p11, %s2701_s20, 0  ;;  %v201_v63 = vld [vmem:[#allocation8 + $0x20] sm:$0xff]  ;;  %v198_v1 = vld [vmem:[#allocation8 + $0x8] sm:$0xff]  ;;  %v200_v2 = vld [vmem:[#allocation8 + $0x18] sm:$0xff] }
  0x40   :  { %305 = vmatprep.subr.mxu0 %v214_v44  ;;  %382 = vmatprep.subr.mxu1 %v216_v45  ;;  %s104_s21 = scalar_lea.vmem %s3745_s1, %s3986_s10  ;;  %s2769_s19 = sld [smem:[#allocation5 + $0x83]]  ;;  %v197_v3 = vld [vmem:[#allocation8] sm:$0xff]  ;;  %v199_v5 = vld [vmem:[#allocation8 + $0x10] sm:$0xff]  ;;  %v2782_v6 = vld [vmem:[#allocation9 + $0x1e8] sm:$0xff] }
  0x41   :  { %306 = vmatpush1.msra.mxu0 %v213_v46  ;;  %383 = vmatpush1.msra.mxu1 %v215_v47  ;;  %v105_v62 = vld [vmem:[%s104_s21] sm:$0x1]  ;;  %s3988_s17 = smov (!%p2197_p12, %s109_s17), 49  ;;  %s2774_s26 = sld [smem:[#allocation5 + $0x4]]  ;;  %3843 = vst [vmem:[#allocation14_spill] sm:$0xff] %v2782_v6  ;;  %v2784_v7 = vld [vmem:[#allocation9 + $0x1f8] sm:$0xff] }
  0x42   :  { %307 = vmatprep.subr.mxu0 %v210_v48  ;;  %384 = vmatprep.subr.mxu1 %v212_v49  ;;  %106 = vst [vmem:[#allocation2 + $0x4] sm:$0x1] %v105_v62  ;;  %s112_s25 = scalar_lea.vmem %s3745_s1, %s3988_s17  ;;  %s2776_s20 = sld [smem:[#allocation5 + $0x84]]  ;;  %3844 = vst [vmem:[#allocation15_spill] sm:$0xff] %v2784_v7  ;;  %v2819_v12 = vld [vmem:[#allocation9 + $0x1e0] sm:$0xff]  ;;  %v2821_v13 = vld [vmem:[#allocation9 + $0x1f0] sm:$0xff] }
  0x43   :  { %308 = vmatpush1.msra.mxu0 %v209_v54  ;;  %385 = vmatpush1.msra.mxu1 %v211_v55  ;;  %v113_v4 = vld [vmem:[%s112_s25] sm:$0x1]  ;;  %s2778_s27 = sld [smem:[#allocation5 + $0x5]]  ;;  %v2825_v16 = vld [vmem:[#allocation9 + $0x1c8] sm:$0xff]  ;;  %v2827_v17 = vld [vmem:[#allocation9 + $0x1d8] sm:$0xff] }
  0x44   :  { %309 = vmatprep.subr.mxu0 %v206_v56  ;;  %386 = vmatprep.subr.mxu1 %v208_v57  ;;  %114 = vst [vmem:[#allocation2 + $0x5] sm:$0x1] %v113_v4  ;;  %p116_p13 = scmp.gt.s32.totalorder %s2765_s22, 0  ;;  %p2203_p0 = scmp.lt.s32.totalorder %s2765_s22, 49  ;;  %v2829_v18 = vld [vmem:[#allocation9 + $0x1c0] sm:$0xff]  ;;  %v2831_v19 = vld [vmem:[#allocation9 + $0x1d0] sm:$0xff] }
  0x45   :  { %310 = vmatpush1.msra.mxu0 %v205_v58  ;;  %387 = vmatpush1.msra.mxu1 %v207_v59  ;;  %s2787_s28 = sld [smem:[#allocation5 + $0x85]]  ;;  %v2836_v20 = vld [vmem:[#allocation9 + $0x1a8] sm:$0xff]  ;;  %v2838_v21 = vld [vmem:[#allocation9 + $0x1b8] sm:$0xff]  ;;  %v2847_v22 = vld [vmem:[#allocation9 + $0x1a0] sm:$0xff] }
  0x46   :  { %311 = vmatprep.subr.mxu0 %v202_v60  ;;  %388 = vmatprep.subr.mxu1 %v204_v61  ;;  %s117_s29 = scalar_select %p116_p13, %s2765_s22, 0  ;;  %v2849_v23 = vld [vmem:[#allocation9 + $0x1b0] sm:$0xff]  ;;  %v2855_v25 = vld [vmem:[#allocation9 + $0x188] sm:$0xff]  ;;  %v2857_v26 = vld [vmem:[#allocation9 + $0x198] sm:$0xff] }
  0x47   :  { %312 = vmatpush1.msra.mxu0 %v201_v63  ;;  %389 = vmatpush1.msra.mxu1 %v203_v0  ;;  %p124_p1 = scmp.gt.s32.totalorder %s2769_s19, 0  ;;  %p2209_p2 = scmp.lt.s32.totalorder %s2769_s19, 49  ;;  %v2863_v27 = vld [vmem:[#allocation9 + $0x180] sm:$0xff]  ;;  %v2865_v28 = vld [vmem:[#allocation9 + $0x190] sm:$0xff]  ;;  %v2872_v29 = vld [vmem:[#allocation9 + $0x168] sm:$0xff] }
  0x48   :  { %313 = vmatprep.subr.mxu0 %v198_v1  ;;  %390 = vmatprep.subr.mxu1 %v200_v2  ;;  %s3990_s29 = smov (!%p2203_p0, %s117_s29), 49  ;;  %p132_p3 = scmp.gt.s32.totalorder %s2774_s26, 0  ;;  %v2874_v30 = vld [vmem:[#allocation9 + $0x178] sm:$0xff]  ;;  %v2880_v32 = vld [vmem:[#allocation9 + $0x160] sm:$0xff]  ;;  %v2882_v33 = vld [vmem:[#allocation9 + $0x170] sm:$0xff] }
  0x49   :  { %314 = vmatpush1.msra.mxu0 %v197_v3  ;;  %347 = vmatprep.mubr.f32.mxu0 %v3754_v8  ;;  %s3992_s19 = smov (!%p124_p1, %s2769_s19), 0  ;;  %s120_s0 = scalar_lea.vmem %s3745_s1, %s3990_s29  ;;  %v2886_v34 = vld [vmem:[#allocation9 + $0x148] sm:$0xff]  ;;  %v2888_v35 = vld [vmem:[#allocation9 + $0x158] sm:$0xff]  ;;  %v2894_v36 = vld [vmem:[#allocation9 + $0x140] sm:$0xff] }
  0x4a   :  { %391 = vmatpush1.msra.mxu1 %v199_v5  ;;  %424 = vmatprep.mubr.f32.mxu1 %v3754_v8  ;;  %v121_v9 = vld [vmem:[%s120_s0] sm:$0x1]  ;;  %s3994_s19 = smov (!%p2209_p2, %s3992_s19), 49  ;;  %p2215_p4 = scmp.lt.s32.totalorder %s2774_s26, 49  ;;  %v2896_v37 = vld [vmem:[#allocation9 + $0x150] sm:$0xff]  ;;  %v2902_v38 = vld [vmem:[#allocation9 + $0x128] sm:$0xff] }
  0x4b   :  { %513 = vmatprep.subr.mxu0 %v2782_v6  ;;  %584 = vmatprep.subr.mxu1 %v2784_v7  ;;  %122 = vst [vmem:[#allocation2 + $0x6] sm:$0x1] %v121_v9  ;;  %s133_s9 = scalar_select %p132_p3, %s2774_s26, 0  ;;  %v2904_v39 = vld [vmem:[#allocation9 + $0x138] sm:$0xff]  ;;  %v2909_v40 = vld [vmem:[#allocation9 + $0x120] sm:$0xff]  ;;  %v2911_v41 = vld [vmem:[#allocation9 + $0x130] sm:$0xff] }
  0x4c   :  { %s128_s12 = scalar_lea.vmem %s3745_s1, %s3994_s19  ;;  %p140_p5 = scmp.gt.s32.totalorder %s2776_s20, 0  ;;  %v2917_v42 = vld [vmem:[#allocation9 + $0x108] sm:$0xff]  ;;  %v2919_v43 = vld [vmem:[#allocation9 + $0x118] sm:$0xff]  ;;  %v2925_v44 = vld [vmem:[#allocation9 + $0x100] sm:$0xff] }
  0x4d   :  { %v129_v10 = vld [vmem:[%s128_s12] sm:$0x1]  ;;  %p2221_p6 = scmp.lt.s32.totalorder %s2776_s20, 49  ;;  %s3996_s9 = smov (!%p2215_p4, %s133_s9), 49  ;;  %v2927_v45 = vld [vmem:[#allocation9 + $0x110] sm:$0xff]  ;;  %v2932_v46 = vld [vmem:[#allocation9 + $0xe8] sm:$0xff] }
  0x4e   :  { %130 = vst [vmem:[#allocation2 + $0x7] sm:$0x1] %v129_v10  ;;  %s3998_s20 = smov (!%p140_p5, %s2776_s20), 0  ;;  %s136_s15 = scalar_lea.vmem %s3745_s1, %s3996_s9  ;;  %v2934_v47 = vld [vmem:[#allocation9 + $0xf8] sm:$0xff]  ;;  %v2942_v48 = vld [vmem:[#allocation9 + $0xe0] sm:$0xff]  ;;  %v2944_v49 = vld [vmem:[#allocation9 + $0xf0] sm:$0xff] }
  0x4f   :  { %p148_p7 = scmp.gt.s32.totalorder %s2778_s27, 0  ;;  %v137_v11 = vld [vmem:[%s136_s15] sm:$0x1]  ;;  %s4000_s20 = smov (!%p2221_p6, %s3998_s20), 49  ;;  %v2950_v51 = vld [vmem:[#allocation9 + $0xc8] sm:$0xff]  ;;  %v2952_v52 = vld [vmem:[#allocation9 + $0xd8] sm:$0xff] }
  0x50   :  { %138 = vst [vmem:[#allocation2 + $0x8] sm:$0x1] %v137_v11  ;;  %s144_s3 = scalar_lea.vmem %s3745_s1, %s4000_s20  ;;  %p2227_p8 = scmp.lt.s32.totalorder %s2778_s27, 49  ;;  %v2957_v53 = vld [vmem:[#allocation9 + $0xc0] sm:$0xff]  ;;  %v2959_v54 = vld [vmem:[#allocation9 + $0xd0] sm:$0xff]  ;;  %v2967_v55 = vld [vmem:[#allocation9 + $0xa8] sm:$0xff] }
  0x51   :  { %s149_s16 = scalar_select %p148_p7, %s2778_s27, 0  ;;  %v145_v14 = vld [vmem:[%s144_s3] sm:$0x1]  ;;  %v2969_v56 = vld [vmem:[#allocation9 + $0xb8] sm:$0xff]  ;;  %v2977_v59 = vld [vmem:[#allocation9 + $0xb0] sm:$0xff] }
  0x52   :  { %p156_p9 = scmp.gt.s32.totalorder %s2787_s28, 0  ;;  %p2233_p10 = scmp.lt.s32.totalorder %s2787_s28, 49  ;;  %146 = vst [vmem:[#allocation2 + $0x9] sm:$0x1] %v145_v14  ;;  %v2975_v58 = vld [vmem:[#allocation9 + $0xa0] sm:$0xff]  ;;  %v2981_v60 = vld [vmem:[#allocation9 + $0x88] sm:$0xff] }
  0x53   :  { %s4002_s16 = smov (!%p2227_p8, %s149_s16), 49  ;;  %s2843_s23 = sld [smem:[#allocation5 + $0x6]]  ;;  %3845 = vst [vmem:[#allocation16_spill] sm:$0xff] %v2981_v60  ;;  %v2983_v61 = vld [vmem:[#allocation9 + $0x98] sm:$0xff]  ;;  %v2988_v62 = vld [vmem:[#allocation9 + $0x80] sm:$0xff]  ;;  %v2990_v63 = vld [vmem:[#allocation9 + $0x90] sm:$0xff] }
  0x54   :  { %s157_s18 = scalar_select %p156_p9, %s2787_s28, 0  ;;  %3846 = vst [vmem:[#allocation17_spill] sm:$0xff] %v2983_v61  ;;  %3847 = vst [vmem:[#allocation18_spill] sm:$0xff] %v2988_v62  ;;  %v2997_v0 = vld [vmem:[#allocation9 + $0x68] sm:$0xff]  ;;  %v2999_v1 = vld [vmem:[#allocation9 + $0x78] sm:$0xff] }
  0x55   :  { %v195_v15 = vld [vmem:[#allocation2] sm:$0xff]  ;;  %s152_s19 = scalar_lea.vmem %s3745_s1, %s4002_s16  ;;  %s2859_s24 = sld [smem:[#allocation5 + $0x86]]  ;;  %3848 = vst [vmem:[#allocation19_spill] sm:$0xff] %v2990_v63  ;;  %3849 = vst [vmem:[#allocation20_spill] sm:$0xff] %v2997_v0  ;;  %v3009_v4 = vld [vmem:[#allocation9 + $0x70] sm:$0xff] }
  0x56   :  { %348 = vmatmul.mubr.f32.vlgmr.msra.gmra.mxu0 %v195_v15  ;;  %425 = vmatmul.mubr.f32.vlgmr.msra.gmra.mxu1 %v195_v15  ;;  %v153_v24 = vld [vmem:[%s152_s19] sm:$0x1]  ;;  %s4004_s18 = smov (!%p2233_p10, %s157_s18), 49  ;;  %s2876_s27 = sld [smem:[#allocation5 + $0x7]]  ;;  %3850 = vst [vmem:[#allocation21_spill] sm:$0xff] %v2999_v1  ;;  %3852 = vst [vmem:[#allocation23_spill] sm:$0xff] %v3009_v4 }
  0x57   :  { %514 = vmatpush1.msra.mxu0 %v2819_v12  ;;  %585 = vmatpush1.msra.mxu1 %v2821_v13  ;;  %154 = vst [vmem:[#allocation2 + $0xa] sm:$0x1] %v153_v24  ;;  %s160_s20 = scalar_lea.vmem %s3745_s1, %s4004_s18  ;;  %s2898_s28 = sld [smem:[#allocation5 + $0x87]]  ;;  %v3005_v3 = vld [vmem:[#allocation9 + $0x60] sm:$0xff]  ;;  %v3014_v5 = vld [vmem:[#allocation9 + $0x48] sm:$0xff]  ;;  %v3018_v10 = vld [vmem:[#allocation9 + $0x58] sm:$0xff] }
  0x58   :  { %515 = vmatprep.subr.mxu0 %v2825_v16  ;;  %586 = vmatprep.subr.mxu1 %v2827_v17  ;;  %v161_v31 = vld [vmem:[%s160_s20] sm:$0x1]  ;;  %3851 = vst [vmem:[#allocation22_spill] sm:$0xff] %v3005_v3  ;;  %3853 = vst [vmem:[#allocation24_spill] sm:$0xff] %v3014_v5  ;;  %v3024_v14 = vld [vmem:[#allocation9 + $0x50] sm:$0xff] }
  0x59   :  { %516 = vmatpush1.msra.mxu0 %v2829_v18  ;;  %587 = vmatpush1.msra.mxu1 %v2831_v19  ;;  %162 = vst [vmem:[#allocation2 + $0xb] sm:$0x1] %v161_v31  ;;  %p164_p11 = scmp.gt.s32.totalorder %s2843_s23, 0  ;;  %p2239_p12 = scmp.lt.s32.totalorder %s2843_s23, 49  ;;  %3854 = vst [vmem:[#allocation25_spill] sm:$0xff] %v3018_v10  ;;  %v3022_v11 = vld [vmem:[#allocation9 + $0x40] sm:$0xff] }
  0x5a   :  { %517 = vmatprep.subr.mxu0 %v2836_v20  ;;  %588 = vmatprep.subr.mxu1 %v2838_v21  ;;  %3855 = vst [vmem:[#allocation26_spill] sm:$0xff] %v3022_v11  ;;  %3856 = vst [vmem:[#allocation27_spill] sm:$0xff] %v3024_v14  ;;  %v3028_v15 = vld [vmem:[#allocation9 + $0x28] sm:$0xff]  ;;  %v3030_v24 = vld [vmem:[#allocation9 + $0x38] sm:$0xff] }
  0x5b   :  { %518 = vmatpush1.msra.mxu0 %v2847_v22  ;;  %589 = vmatpush1.msra.mxu1 %v2849_v23  ;;  %s165_s29 = scalar_select %p164_p11, %s2843_s23, 0  ;;  %3857 = vst [vmem:[#allocation28_spill] sm:$0xff] %v3028_v15  ;;  %3858 = vst [vmem:[#allocation29_spill] sm:$0xff] %v3030_v24  ;;  %v3034_v31 = vld [vmem:[#allocation9 + $0x20] sm:$0xff] }
  0x5c   :  { %519 = vmatprep.subr.mxu0 %v2855_v25  ;;  %590 = vmatprep.subr.mxu1 %v2857_v26  ;;  %p172_p13 = scmp.gt.s32.totalorder %s2859_s24, 0  ;;  %p2245_p0 = scmp.lt.s32.totalorder %s2859_s24, 49  ;;  %3859 = vst [vmem:[#allocation30_spill] sm:$0xff] %v3034_v31 }
  0x5d   :  { %520 = vmatpush1.msra.mxu0 %v2863_v27  ;;  %591 = vmatpush1.msra.mxu1 %v2865_v28  ;;  %s4006_s29 = smov (!%p2239_p12, %s165_s29), 49  ;;  %p180_p1 = scmp.gt.s32.totalorder %s2876_s27, 0 }
  0x5e   :  { %521 = vmatprep.subr.mxu0 %v2872_v29  ;;  %592 = vmatprep.subr.mxu1 %v2874_v30  ;;  %s173_s30 = scalar_select %p172_p13, %s2859_s24, 0 }
  0x5f   :  { %522 = vmatpush1.msra.mxu0 %v2880_v32  ;;  %593 = vmatpush1.msra.mxu1 %v2882_v33  ;;  %s168_s9 = scalar_lea.vmem %s3745_s1, %s4006_s29  ;;  %p2251_p2 = scmp.lt.s32.totalorder %s2876_s27, 49 }
  0x60   :  { %523 = vmatprep.subr.mxu0 %v2886_v34  ;;  %594 = vmatprep.subr.mxu1 %v2888_v35  ;;  %v169_v50 = vld [vmem:[%s168_s9] sm:$0x1]  ;;  %s4008_s30 = smov (!%p2245_p0, %s173_s30), 49  ;;  %p188_p3 = scmp.gt.s32.totalorder %s2898_s28, 0 }
  0x61   :  { %524 = vmatpush1.msra.mxu0 %v2894_v36  ;;  %595 = vmatpush1.msra.mxu1 %v2896_v37  ;;  %170 = vst [vmem:[#allocation2 + $0xc] sm:$0x1] %v169_v50  ;;  %s181_s10 = scalar_select %p180_p1, %s2876_s27, 0  ;;  %v3036_v50 = vld [vmem:[#allocation9 + $0x30] sm:$0xff] }
  0x62   :  { %525 = vmatprep.subr.mxu0 %v2902_v38  ;;  %596 = vmatprep.subr.mxu1 %v2904_v39  ;;  %s176_s13 = scalar_lea.vmem %s3745_s1, %s4008_s30  ;;  %p2257_p4 = scmp.lt.s32.totalorder %s2898_s28, 49  ;;  %3860 = vst [vmem:[#allocation31_spill] sm:$0xff] %v3036_v50 }
  0x63   :  { %526 = vmatpush1.msra.mxu0 %v2909_v40  ;;  %597 = vmatpush1.msra.mxu1 %v2911_v41  ;;  %v177_v57 = vld [vmem:[%s176_s13] sm:$0x1]  ;;  %s4010_s10 = smov (!%p2251_p2, %s181_s10), 49 }
  0x64   :  { %527 = vmatprep.subr.mxu0 %v2917_v42  ;;  %598 = vmatprep.subr.mxu1 %v2919_v43  ;;  %178 = vst [vmem:[#allocation2 + $0xd] sm:$0x1] %v177_v57  ;;  %s189_s14 = scalar_select %p188_p3, %s2898_s28, 0  ;;  %v3040_v57 = vld [vmem:[#allocation9 + $0x8] sm:$0xff] }
  0x65   :  { %528 = vmatpush1.msra.mxu0 %v2925_v44  ;;  %599 = vmatpush1.msra.mxu1 %v2927_v45  ;;  %s184_s2 = scalar_lea.vmem %s3745_s1, %s4010_s10  ;;  %3861 = vst [vmem:[#allocation32_spill] sm:$0xff] %v3040_v57 }
  0x66   :  { %529 = vmatprep.subr.mxu0 %v2932_v46  ;;  %600 = vmatprep.subr.mxu1 %v2934_v47  ;;  %v185_v2 = vld [vmem:[%s184_s2] sm:$0x1]  ;;  %s4012_s14 = smov (!%p2257_p4, %s189_s14), 49 }
  0x67   :  { %530 = vmatpush1.msra.mxu0 %v2942_v48  ;;  %601 = vmatpush1.msra.mxu1 %v2944_v49  ;;  %186 = vst [vmem:[#allocation2 + $0xe] sm:$0x1] %v185_v2  ;;  %s192_s18 = scalar_lea.vmem %s3745_s1, %s4012_s14  ;;  %v3042_v2 = vld [vmem:[#allocation9 + $0x18] sm:$0xff] }
  0x68   :  { %531 = vmatprep.subr.mxu0 %v2950_v51  ;;  %602 = vmatprep.subr.mxu1 %v2952_v52  ;;  %v193_v9 = vld [vmem:[%s192_s18] sm:$0x1]  ;;  %3862 = vst [vmem:[#allocation33_spill] sm:$0xff] %v3042_v2 }
  0x69   :  { %532 = vmatpush1.msra.mxu0 %v2957_v53  ;;  %603 = vmatpush1.msra.mxu1 %v2959_v54  ;;  %194 = vst [vmem:[#allocation2 + $0xf] sm:$0x1] %v193_v9  ;;  %v3046_v9 = vld [vmem:[#allocation9] sm:$0xff] }
  0x6a   :  { %533 = vmatprep.subr.mxu0 %v2967_v55  ;;  %604 = vmatprep.subr.mxu1 %v2969_v56  ;;  %3863 = vst [vmem:[#allocation34_spill] sm:$0xff] %v3046_v9 }
  0x6b   :  { %534 = vmatpush1.msra.mxu0 %v2975_v58  ;;  %605 = vmatpush1.msra.mxu1 %v2977_v59 }
  0x6c   :  { %535 = vmatprep.subr.mxu0 %v2981_v60  ;;  %606 = vmatprep.subr.mxu1 %v2983_v61 }
  0x6d   :  { %536 = vmatpush1.msra.mxu0 %v2988_v62  ;;  %607 = vmatpush1.msra.mxu1 %v2990_v63 }
  0x6e   :  { %537 = vmatprep.subr.mxu0 %v2997_v0  ;;  %608 = vmatprep.subr.mxu1 %v2999_v1 }
  0x6f   :  { %353 = vmatprep.mubr.f32.mxu0 %v3754_v8  ;;  %538 = vmatpush1.msra.mxu0 %v3005_v3 }
  0x70   :  { %609 = vmatpush1.msra.mxu1 %v3009_v4  ;;  %539 = vmatprep.subr.mxu0 %v3014_v5 }
  0x71   :  { %610 = vmatprep.subr.mxu1 %v3018_v10  ;;  %430 = vmatprep.mubr.f32.mxu1 %v3754_v8  ;;  %v3048_v10 = vld [vmem:[#allocation9 + $0x10] sm:$0xff]  ;;  %v196_v8 = vld [vmem:[#allocation2 + $0x8] sm:$0xff] }
  0x72   :  { %540 = vmatpush1.msra.mxu0 %v3022_v11  ;;  %611 = vmatpush1.msra.mxu1 %v3024_v14  ;;  %3864 = vst [vmem:[#allocation35_spill] sm:$0xff] %v3048_v10 }
  0x73   :  { %541 = vmatprep.subr.mxu0 %v3028_v15  ;;  %612 = vmatprep.subr.mxu1 %v3030_v24  ;;  %v3865_v24 = vmov 0.0  }
  0x74   :  { %542 = vmatpush1.msra.mxu0 %v3034_v31  ;;  %613 = vmatpush1.msra.mxu1 %v3036_v50 }
  0x75   :  { %543 = vmatprep.subr.mxu0 %v3040_v57  ;;  %614 = vmatprep.subr.mxu1 %v3042_v2 }
  0x76   :  { %544 = vmatpush1.msra.mxu0 %v3046_v9  ;;  %615 = vmatpush1.msra.mxu1 %v3048_v10 }
  0x77   :  { %354 = vmatmul.mubr.f32.gmra.mxu0 %v196_v8  ;;  %431 = vmatmul.mubr.f32.gmra.mxu1 %v196_v8  ;;  %v3866_v8 = vld [vmem:[#allocation25_spill] sm:$0xff] }
  0x78   :  { %577 = vmatprep.mubr.f32.mxu0 %v3865_v24  ;;  %648 = vmatprep.mubr.f32.mxu1 %v3865_v24 }
  0x79   :  { %688 = vmatprep.subr.mxu0 %v2782_v6  ;;  %759 = vmatprep.subr.mxu1 %v2784_v7 }
  0x7b   :  { %578 = vmatmul.mubr.f32.vlgmr.msra.gmra.mxu0 %v3865_v24  ;;  %649 = vmatmul.mubr.f32.vlgmr.msra.gmra.mxu1 %v3865_v24 }
  0x7c   :  { %689 = vmatpush1.msra.mxu0 %v2819_v12  ;;  %760 = vmatpush1.msra.mxu1 %v2821_v13 }
  0x7d   :  { %690 = vmatprep.subr.mxu0 %v2825_v16  ;;  %761 = vmatprep.subr.mxu1 %v2827_v17 }
  0x7e   :  { %691 = vmatpush1.msra.mxu0 %v2829_v18  ;;  %762 = vmatpush1.msra.mxu1 %v2831_v19 }
  0x7f   :  { %692 = vmatprep.subr.mxu0 %v2836_v20  ;;  %763 = vmatprep.subr.mxu1 %v2838_v21 }
  0x80   :  { %693 = vmatpush1.msra.mxu0 %v2847_v22  ;;  %764 = vmatpush1.msra.mxu1 %v2849_v23 }
  0x81   :  { %694 = vmatprep.subr.mxu0 %v2855_v25  ;;  %765 = vmatprep.subr.mxu1 %v2857_v26 }
  0x82   :  { %695 = vmatpush1.msra.mxu0 %v2863_v27  ;;  %766 = vmatpush1.msra.mxu1 %v2865_v28 }
  0x83   :  { %696 = vmatprep.subr.mxu0 %v2872_v29  ;;  %767 = vmatprep.subr.mxu1 %v2874_v30 }
  0x84   :  { %697 = vmatpush1.msra.mxu0 %v2880_v32  ;;  %768 = vmatpush1.msra.mxu1 %v2882_v33 }
  0x85   :  { %698 = vmatprep.subr.mxu0 %v2886_v34  ;;  %769 = vmatprep.subr.mxu1 %v2888_v35 }
  0x86   :  { %699 = vmatpush1.msra.mxu0 %v2894_v36  ;;  %770 = vmatpush1.msra.mxu1 %v2896_v37 }
  0x87   :  { %700 = vmatprep.subr.mxu0 %v2902_v38  ;;  %771 = vmatprep.subr.mxu1 %v2904_v39 }
  0x88   :  { %701 = vmatpush1.msra.mxu0 %v2909_v40  ;;  %772 = vmatpush1.msra.mxu1 %v2911_v41 }
  0x89   :  { %702 = vmatprep.subr.mxu0 %v2917_v42  ;;  %773 = vmatprep.subr.mxu1 %v2919_v43 }
  0x8a   :  { %703 = vmatpush1.msra.mxu0 %v2925_v44  ;;  %774 = vmatpush1.msra.mxu1 %v2927_v45 }
  0x8b   :  { %704 = vmatprep.subr.mxu0 %v2932_v46  ;;  %775 = vmatprep.subr.mxu1 %v2934_v47 }
  0x8c   :  { %705 = vmatpush1.msra.mxu0 %v2942_v48  ;;  %776 = vmatpush1.msra.mxu1 %v2944_v49 }
  0x8d   :  { %706 = vmatprep.subr.mxu0 %v2950_v51  ;;  %777 = vmatprep.subr.mxu1 %v2952_v52 }
  0x8e   :  { %707 = vmatpush1.msra.mxu0 %v2957_v53  ;;  %778 = vmatpush1.msra.mxu1 %v2959_v54 }
  0x8f   :  { %708 = vmatprep.subr.mxu0 %v2967_v55  ;;  %779 = vmatprep.subr.mxu1 %v2969_v56 }
  0x90   :  { %709 = vmatpush1.msra.mxu0 %v2975_v58  ;;  %780 = vmatpush1.msra.mxu1 %v2977_v59 }
  0x91   :  { %710 = vmatprep.subr.mxu0 %v2981_v60  ;;  %781 = vmatprep.subr.mxu1 %v2983_v61 }
  0x92   :  { %711 = vmatpush1.msra.mxu0 %v2988_v62  ;;  %782 = vmatpush1.msra.mxu1 %v2990_v63  ;;  %v3867_v62 = vld [vmem:[#allocation29_spill] sm:$0xff] }
  0x93   :  { %712 = vmatprep.subr.mxu0 %v2997_v0  ;;  %783 = vmatprep.subr.mxu1 %v2999_v1 }
  0x94   :  { %713 = vmatpush1.msra.mxu0 %v3005_v3  ;;  %784 = vmatpush1.msra.mxu1 %v3009_v4 }
  0x95   :  { %714 = vmatprep.subr.mxu0 %v3014_v5  ;;  %785 = vmatprep.subr.mxu1 %v3866_v8 }
  0x96   :  { %715 = vmatpush1.msra.mxu0 %v3022_v11  ;;  %786 = vmatpush1.msra.mxu1 %v3024_v14 }
  0x97   :  { %716 = vmatprep.subr.mxu0 %v3028_v15  ;;  %787 = vmatprep.subr.mxu1 %v3867_v62  ;;  %v263_v62 = vlaneseq }
  0x98   :  { %717 = vmatpush1.msra.mxu0 %v3034_v31  ;;  %788 = vmatpush1.msra.mxu1 %v3036_v50 }
  0x99   :  { %718 = vmatprep.subr.mxu0 %v3040_v57  ;;  %789 = vmatprep.subr.mxu1 %v3042_v2  ;;  %v264_v31 = vshrl.u32 %v263_v62, 7  ;;  %v261_v2 = vld [vmem:[%s3748_s4] sm:$0xf] }
  0x9a   :  { %719 = vmatpush1.msra.mxu0 %v3046_v9  ;;  %752 = vmatprep.mubr.f32.mxu0 %v3865_v24 }
  0x9b   :  { %790 = vmatpush1.msra.mxu1 %v3048_v10  ;;  %823 = vmatprep.mubr.f32.mxu1 %v3865_v24  ;;  %v265_v15 = vsub.s32 0, %v264_v31  ;;  %v273_v50 = vsub.s32 2, %v264_v31  ;;  %v269_v57 = vsub.s32 1, %v264_v31  ;;  %v277_v9 = vsub.s32 3, %v264_v31 }
  0x9c   :  { %881 = vmatprep.subr.mxu0 %v2782_v6  ;;  %952 = vmatprep.subr.mxu1 %v2784_v7 }
  0x9d   :  { %v266_v14 = vrot.slane %v261_v2, %v265_v15  ;;  %v274_v11 = vrot.slane %v261_v2, %v273_v50  ;;  %v270_v8 = vrot.slane %v261_v2, %v269_v57  ;;  %v278_v10 = vrot.slane %v261_v2, %v277_v9 }
 0x116   :  { %v349_v5 = vpop.f32.mrf.mxu0  ;;  %v426_v24 = vpop.f32.mrf.mxu1 }
 0x117   :  { %v350_v4 = vadd.f32 %v349_v5, %v266_v14  ;;  %v427_v6 = vadd.f32 %v426_v24, %v274_v11 }
 0x118   :  { %v351_v3 = vpop.f32.mrf.mxu0  ;;  %v428_v7 = vpop.f32.mrf.mxu1 }
 0x119   :  { %437 = vst [vmem:[#allocation3 + $0x30] sm:$0xff] %v350_v4  ;;  %v352_v62 = vadd.f32 %v351_v3, %v270_v8  ;;  %439 = vst [vmem:[#allocation3 + $0x18] sm:$0xff] %v427_v6  ;;  %v429_v1 = vadd.f32 %v428_v7, %v278_v10 }
 0x11b   :  { %438 = vst [vmem:[#allocation3] sm:$0xff] %v352_v62  ;;  %440 = vst [vmem:[#allocation3 + $0x10] sm:$0xff] %v429_v1 }
 0x120   :  { %v509_v5 = vld [vmem:[#allocation3 + $0x30] sm:$0x3] }
 0x122   :  { %v510_v3 = vld [vmem:[#allocation3] sm:$0x3] }
 0x137   :  { %v355_v0 = vpop.f32.mrf.mxu0  ;;  %v432_v63 = vpop.f32.mrf.mxu1 }
 0x138   :  { %v356_v61 = vadd.f32 %v355_v0, %v266_v14  ;;  %v433_v31 = vadd.f32 %v432_v63, %v274_v11  ;;  %v511_v63 = vld [vmem:[#allocation3 + $0x18] sm:$0x3] }
 0x139   :  { %v357_v15 = vpop.f32.mrf.mxu0  ;;  %v434_v50 = vpop.f32.mrf.mxu1 }
 0x13a   :  { %441 = vst [vmem:[#allocation3 + $0x8] sm:$0xff] %v356_v61  ;;  %v358_v57 = vadd.f32 %v357_v15, %v270_v8  ;;  %443 = vst [vmem:[#allocation3 + $0x28] sm:$0xff] %v433_v31  ;;  %v435_v2 = vadd.f32 %v434_v50, %v278_v10  ;;  %v512_v8 = vld [vmem:[#allocation3 + $0x10] sm:$0x3] }
 0x13b   :  { %v579_v24 = vpop.f32.mrf.mxu0  ;;  %v650_v0 = vpop.f32.mrf.mxu1 }
 0x13c   :  { %442 = vst [vmem:[#allocation3 + $0x20] sm:$0xff] %v358_v57  ;;  %444 = vst [vmem:[#allocation3 + $0x38] sm:$0xff] %v435_v2  ;;  %v655_v4 = vadd.f32 %v579_v24, %v509_v5  ;;  %v657_v11 = vadd.f32 %v650_v0, %v511_v63  ;;  %v3868_v63 = vld [vmem:[#allocation17_spill] sm:$0xff] }
 0x13d   :  { %v581_v6 = vpop.f32.mrf.mxu0  ;;  %v652_v14 = vpop.f32.mrf.mxu1 }
 0x13e   :  { %v2262_v7 = vmul.f32 -1.442695, %v655_v4  ;;  %v656_v9 = vadd.f32 %v581_v6, %v510_v3  ;;  %v2264_v61 = vmul.f32 -1.442695, %v657_v11  ;;  %v658_v10 = vadd.f32 %v652_v14, %v512_v8  ;;  %v3869_v11 = vld [vmem:[#allocation18_spill] sm:$0xff]  ;;  %v3870_v14 = vld [vmem:[#allocation19_spill] sm:$0xff] }
 0x13f   :  { %v3872_v8 = vld [vmem:[#allocation21_spill] sm:$0xff] }
 0x140   :  { %2378 = vpow2.f32 %v2262_v7  ;;  %v2263_v1 = vmul.f32 -1.442695, %v656_v9 }
 0x142   :  { %2380 = vpow2.f32 %v2263_v1 }
 0x143   :  { %2382 = vpow2.f32 %v2264_v61  ;;  %v3871_v61 = vld [vmem:[#allocation20_spill] sm:$0xff] }
 0x14d   :  { %v2379_v62 = vpop.eup %2378 }
 0x14e   :  { %v668_v31 = vadd.f32 1.0, %v2379_v62  ;;  %v3873_v62 = vld [vmem:[#allocation22_spill] sm:$0xff] }
 0x14f   :  { %v2381_v15 = vpop.eup %2380 }
 0x150   :  { %2384 = vrcp.f32 %v668_v31  ;;  %v669_v50 = vadd.f32 1.0, %v2381_v15  ;;  %v2383_v57 = vpop.eup %2382  ;;  %v3875_v31 = vld [vmem:[#allocation24_spill] sm:$0xff]  ;;  %v3876_v15 = vld [vmem:[#allocation25_spill] sm:$0xff] }
 0x151   :  { %2386 = vtanh.f32 %v658_v10  ;;  %v670_v4 = vadd.f32 1.0, %v2383_v57  ;;  %v3874_v10 = vld [vmem:[#allocation23_spill] sm:$0xff] }
 0x152   :  { %2388 = vrcp.f32 %v669_v50  ;;  %v3877_v50 = vld [vmem:[#allocation26_spill] sm:$0xff]  ;;  %v3878_v57 = vld [vmem:[#allocation27_spill] sm:$0xff] }
 0x153   :  { %2390 = vrcp.f32 %v670_v4  ;;  %v3882_v4 = vld [vmem:[#allocation31_spill] sm:$0xff] }
 0x15d   :  { %v2385_v2 = vpop.eup %2384 }
 0x15e   :  { %v2387_v5 = vpop.eup %2386 }
 0x15f   :  { %v2389_v24 = vpop.eup %2388  ;;  %v679_v6 = vmul.f32 %v2387_v5, %v2385_v2  ;;  %v3879_v2 = vld [vmem:[#allocation28_spill] sm:$0xff]  ;;  %v3880_v5 = vld [vmem:[#allocation29_spill] sm:$0xff] }
 0x160   :  { %v678_v3 = vmul.f32 0.0, %v2389_v24  ;;  %v2391_v9 = vpop.eup %2390  ;;  %v3881_v24 = vld [vmem:[#allocation30_spill] sm:$0xff] }
 0x162   :  { %v3131_v7 = vadd.f32 %v679_v6, %v678_v3  ;;  %v3883_v3 = vld [vmem:[#allocation32_spill] sm:$0xff]  ;;  %v3884_v6 = vld [vmem:[#allocation33_spill] sm:$0xff] }
 0x164   :  { %2392 = vtanh.f32 %v3131_v7 }
 0x171   :  { %v2393_v1 = vpop.eup %2392 }
 0x172   :  { %v682_v0 = vmul.f32 %v2393_v1, %v2391_v9  ;;  %v3885_v9 = vld [vmem:[#allocation34_spill] sm:$0xff]  ;;  %v3886_v1 = vmov 0.0  }
 0x174   :  { %683 = vst [vmem:[#allocation4] sm:$0x3] %v682_v0  ;;  %753 = vmatmul.mubr.f32.vlgmr.msra.gmra.mxu0 %v682_v0  ;;  %824 = vmatmul.mubr.f32.vlgmr.msra.gmra.mxu1 %v682_v0  ;;  %v3887_v0 = vld [vmem:[#allocation35_spill] sm:$0xff] }
 0x175   :  { %882 = vmatpush1.msra.mxu0 %v2819_v12  ;;  %953 = vmatpush1.msra.mxu1 %v2821_v13 }
 0x176   :  { %883 = vmatprep.subr.mxu0 %v2825_v16  ;;  %954 = vmatprep.subr.mxu1 %v2827_v17 }
 0x177   :  { %884 = vmatpush1.msra.mxu0 %v2829_v18  ;;  %955 = vmatpush1.msra.mxu1 %v2831_v19 }
 0x178   :  { %885 = vmatprep.subr.mxu0 %v2836_v20  ;;  %956 = vmatprep.subr.mxu1 %v2838_v21 }
 0x179   :  { %886 = vmatpush1.msra.mxu0 %v2847_v22  ;;  %957 = vmatpush1.msra.mxu1 %v2849_v23 }
 0x17a   :  { %887 = vmatprep.subr.mxu0 %v2855_v25  ;;  %958 = vmatprep.subr.mxu1 %v2857_v26 }
 0x17b   :  { %888 = vmatpush1.msra.mxu0 %v2863_v27  ;;  %959 = vmatpush1.msra.mxu1 %v2865_v28 }
 0x17c   :  { %889 = vmatprep.subr.mxu0 %v2872_v29  ;;  %960 = vmatprep.subr.mxu1 %v2874_v30 }
 0x17d   :  { %890 = vmatpush1.msra.mxu0 %v2880_v32  ;;  %961 = vmatpush1.msra.mxu1 %v2882_v33 }
 0x17e   :  { %891 = vmatprep.subr.mxu0 %v2886_v34  ;;  %962 = vmatprep.subr.mxu1 %v2888_v35 }
 0x17f   :  { %892 = vmatpush1.msra.mxu0 %v2894_v36  ;;  %963 = vmatpush1.msra.mxu1 %v2896_v37 }
 0x180   :  { %893 = vmatprep.subr.mxu0 %v2902_v38  ;;  %964 = vmatprep.subr.mxu1 %v2904_v39 }
 0x181   :  { %894 = vmatpush1.msra.mxu0 %v2909_v40  ;;  %965 = vmatpush1.msra.mxu1 %v2911_v41 }
 0x182   :  { %895 = vmatprep.subr.mxu0 %v2917_v42  ;;  %966 = vmatprep.subr.mxu1 %v2919_v43 }
 0x183   :  { %896 = vmatpush1.msra.mxu0 %v2925_v44  ;;  %967 = vmatpush1.msra.mxu1 %v2927_v45 }
 0x184   :  { %897 = vmatprep.subr.mxu0 %v2932_v46  ;;  %968 = vmatprep.subr.mxu1 %v2934_v47 }
 0x185   :  { %898 = vmatpush1.msra.mxu0 %v2942_v48  ;;  %969 = vmatpush1.msra.mxu1 %v2944_v49 }
 0x186   :  { %899 = vmatprep.subr.mxu0 %v2950_v51  ;;  %970 = vmatprep.subr.mxu1 %v2952_v52 }
 0x187   :  { %900 = vmatpush1.msra.mxu0 %v2957_v53  ;;  %971 = vmatpush1.msra.mxu1 %v2959_v54 }
 0x188   :  { %901 = vmatprep.subr.mxu0 %v2967_v55  ;;  %972 = vmatprep.subr.mxu1 %v2969_v56 }
 0x189   :  { %902 = vmatpush1.msra.mxu0 %v2975_v58  ;;  %973 = vmatpush1.msra.mxu1 %v2977_v59 }
 0x18a   :  { %903 = vmatprep.subr.mxu0 %v2981_v60  ;;  %974 = vmatprep.subr.mxu1 %v3868_v63 }
 0x18b   :  { %904 = vmatpush1.msra.mxu0 %v3869_v11  ;;  %975 = vmatpush1.msra.mxu1 %v3870_v14 }
 0x18c   :  { %905 = vmatprep.subr.mxu0 %v3871_v61  ;;  %976 = vmatprep.subr.mxu1 %v3872_v8  ;;  %v686_v8 = vld [vmem:[#allocation3 + $0x18] sm:$0xc] }
 0x18d   :  { %906 = vmatpush1.msra.mxu0 %v3873_v62  ;;  %977 = vmatpush1.msra.mxu1 %v3874_v10 }
 0x18e   :  { %907 = vmatprep.subr.mxu0 %v3875_v31  ;;  %978 = vmatprep.subr.mxu1 %v3876_v15  ;;  %v685_v31 = vld [vmem:[#allocation3] sm:$0xc] }
 0x18f   :  { %908 = vmatpush1.msra.mxu0 %v3877_v50  ;;  %979 = vmatpush1.msra.mxu1 %v3878_v57  ;;  %v3888_v57 = vld [vmem:[#allocation14_spill] sm:$0xff] }
 0x190   :  { %909 = vmatprep.subr.mxu0 %v3879_v2  ;;  %980 = vmatprep.subr.mxu1 %v3880_v5  ;;  %v3889_v2 = vld [vmem:[#allocation15_spill] sm:$0xff]  ;;  %v684_v50 = vld [vmem:[#allocation3 + $0x30] sm:$0xc] }
 0x191   :  { %910 = vmatpush1.msra.mxu0 %v3881_v24  ;;  %981 = vmatpush1.msra.mxu1 %v3882_v4 }
 0x192   :  { %911 = vmatprep.subr.mxu0 %v3883_v3  ;;  %982 = vmatprep.subr.mxu1 %v3884_v6 }
 0x193   :  { %912 = vmatpush1.msra.mxu0 %v3885_v9  ;;  %945 = vmatprep.mubr.f32.mxu0 %v3886_v1 }
 0x194   :  { %983 = vmatpush1.msra.mxu1 %v3887_v0  ;;  %1016 = vmatprep.mubr.f32.mxu1 %v3886_v1 }
 0x195   :  { %1074 = vmatprep.subr.mxu0 %v3888_v57  ;;  %1145 = vmatprep.subr.mxu1 %v3889_v2  ;;  %v687_v2 = vld [vmem:[#allocation3 + $0x10] sm:$0xc] }
 0x234   :  { %v754_v5 = vpop.f32.mrf.mxu0  ;;  %v825_v9 = vpop.f32.mrf.mxu1 }
 0x235   :  { %v834_v24 = vrot.slane %v754_v5, 6  ;;  %v836_v0 = vrot.slane %v825_v9, 6 }
 0x236   :  { %v756_v4 = vpop.f32.mrf.mxu0  ;;  %v827_v1 = vpop.f32.mrf.mxu1 }
 0x237   :  { %v842_v15 = vadd.f32 %v834_v24, %v684_v50  ;;  %v835_v3 = vrot.slane %v756_v4, 6  ;;  %v844_v61 = vadd.f32 %v836_v0, %v686_v8  ;;  %v837_v57 = vrot.slane %v827_v1, 6  ;;  %v874_v1 = vld [vmem:[#allocation3 + $0x30] sm:$0x30] }
 0x239   :  { %v2265_v6 = vmul.f32 -1.442695, %v842_v15  ;;  %v843_v10 = vadd.f32 %v835_v3, %v685_v31  ;;  %v2267_v14 = vmul.f32 -1.442695, %v844_v61  ;;  %v845_v5 = vadd.f32 %v837_v57, %v687_v2 }
 0x23b   :  { %2394 = vpow2.f32 %v2265_v6  ;;  %v2266_v62 = vmul.f32 -1.442695, %v843_v10 }
 0x23d   :  { %2396 = vpow2.f32 %v2266_v62  ;;  %v866_v62 = vrot.slane %v3131_v7, 6  ;;  %v3271_v7 = vld [vmem:[#allocation9 + $0x1f8] sm:$0xff] }
 0x23e   :  { %2398 = vpow2.f32 %v2267_v14  ;;  %3912 = vst [vmem:[#allocation15_spill] sm:$0xff] %v3271_v7 }
 0x248   :  { %v2395_v11 = vpop.eup %2394 }
 0x249   :  { %v855_v63 = vadd.f32 1.0, %v2395_v11 }
 0x24a   :  { %v2397_v60 = vpop.eup %2396 }
 0x24b   :  { %2400 = vrcp.f32 %v855_v63  ;;  %v856_v50 = vadd.f32 1.0, %v2397_v60  ;;  %v2399_v31 = vpop.eup %2398 }
 0x24c   :  { %2402 = vtanh.f32 %v845_v5  ;;  %v857_v4 = vadd.f32 1.0, %v2399_v31  ;;  %v875_v5 = vld [vmem:[#allocation3] sm:$0x30] }
 0x24d   :  { %2404 = vrcp.f32 %v856_v50 }
 0x24e   :  { %2406 = vrcp.f32 %v857_v4 }
 0x258   :  { %v2401_v15 = vpop.eup %2400 }
 0x259   :  { %v2403_v10 = vpop.eup %2402 }
 0x25a   :  { %v2405_v24 = vpop.eup %2404  ;;  %v869_v3 = vmul.f32 %v2403_v10, %v2401_v15 }
 0x25b   :  { %v868_v8 = vmul.f32 %v2405_v24, %v866_v62  ;;  %v2407_v11 = vpop.eup %2406  ;;  %v876_v24 = vld [vmem:[#allocation3 + $0x18] sm:$0x30] }
 0x25d   :  { %v3201_v61 = vadd.f32 %v869_v3, %v868_v8 }
 0x25f   :  { %2408 = vtanh.f32 %v3201_v61 }
 0x26c   :  { %v2409_v14 = vpop.eup %2408 }
 0x26d   :  { %v872_v63 = vmul.f32 %v2409_v14, %v2407_v11  ;;  %v877_v14 = vld [vmem:[#allocation3 + $0x10] sm:$0x30] }
 0x26f   :  { %873 = vst [vmem:[#allocation4] sm:$0xc] %v872_v63  ;;  %v879_v60 = vrot.slane %v872_v63, 2 }
 0x271   :  { %946 = vmatmul.mubr.f32.vlgmr.msra.gmra.mxu0 %v879_v60  ;;  %1017 = vmatmul.mubr.f32.vlgmr.msra.gmra.mxu1 %v879_v60 }
 0x272   :  { %1075 = vmatpush1.msra.mxu0 %v2819_v12  ;;  %1146 = vmatpush1.msra.mxu1 %v2821_v13  ;;  %v3890_v12 = vld [vmem:[#allocation16_spill] sm:$0xff]  ;;  %v3891_v13 = vld [vmem:[#allocation17_spill] sm:$0xff] }
 0x273   :  { %1076 = vmatprep.subr.mxu0 %v2825_v16  ;;  %1147 = vmatprep.subr.mxu1 %v2827_v17  ;;  %v3892_v16 = vld [vmem:[#allocation18_spill] sm:$0xff]  ;;  %v3893_v17 = vld [vmem:[#allocation19_spill] sm:$0xff] }
 0x274   :  { %1077 = vmatpush1.msra.mxu0 %v2829_v18  ;;  %1148 = vmatpush1.msra.mxu1 %v2831_v19  ;;  %v3894_v18 = vld [vmem:[#allocation20_spill] sm:$0xff]  ;;  %v3895_v19 = vld [vmem:[#allocation21_spill] sm:$0xff] }
 0x275   :  { %1078 = vmatprep.subr.mxu0 %v2836_v20  ;;  %1149 = vmatprep.subr.mxu1 %v2838_v21  ;;  %v3896_v20 = vld [vmem:[#allocation22_spill] sm:$0xff]  ;;  %v3897_v21 = vld [vmem:[#allocation23_spill] sm:$0xff] }
 0x276   :  { %1079 = vmatpush1.msra.mxu0 %v2847_v22  ;;  %1150 = vmatpush1.msra.mxu1 %v2849_v23  ;;  %v3898_v22 = vld [vmem:[#allocation24_spill] sm:$0xff]  ;;  %v3899_v23 = vld [vmem:[#allocation25_spill] sm:$0xff] }
 0x277   :  { %1080 = vmatprep.subr.mxu0 %v2855_v25  ;;  %1151 = vmatprep.subr.mxu1 %v2857_v26  ;;  %v3900_v25 = vld [vmem:[#allocation26_spill] sm:$0xff]  ;;  %v3901_v26 = vld [vmem:[#allocation27_spill] sm:$0xff] }
 0x278   :  { %1081 = vmatpush1.msra.mxu0 %v2863_v27  ;;  %1152 = vmatpush1.msra.mxu1 %v2865_v28  ;;  %v3902_v27 = vld [vmem:[#allocation28_spill] sm:$0xff]  ;;  %v3903_v28 = vld [vmem:[#allocation29_spill] sm:$0xff] }
 0x279   :  { %1082 = vmatprep.subr.mxu0 %v2872_v29  ;;  %1153 = vmatprep.subr.mxu1 %v2874_v30  ;;  %v3904_v29 = vld [vmem:[#allocation30_spill] sm:$0xff]  ;;  %v3905_v30 = vld [vmem:[#allocation31_spill] sm:$0xff] }
 0x27a   :  { %1083 = vmatpush1.msra.mxu0 %v2880_v32  ;;  %1154 = vmatpush1.msra.mxu1 %v2882_v33  ;;  %v3906_v32 = vld [vmem:[#allocation32_spill] sm:$0xff]  ;;  %v3907_v33 = vld [vmem:[#allocation33_spill] sm:$0xff] }
 0x27b   :  { %1084 = vmatprep.subr.mxu0 %v2886_v34  ;;  %1155 = vmatprep.subr.mxu1 %v2888_v35  ;;  %v3908_v34 = vld [vmem:[#allocation34_spill] sm:$0xff]  ;;  %v3909_v35 = vmov 0.0  }
 0x27c   :  { %1085 = vmatpush1.msra.mxu0 %v2894_v36  ;;  %1156 = vmatpush1.msra.mxu1 %v2896_v37  ;;  %v3910_v36 = vld [vmem:[#allocation35_spill] sm:$0xff] }
 0x27d   :  { %1086 = vmatprep.subr.mxu0 %v2902_v38  ;;  %1157 = vmatprep.subr.mxu1 %v2904_v39  ;;  %v3268_v37 = vld [vmem:[#allocation9 + $0x1e8] sm:$0xff] }
 0x27e   :  { %1087 = vmatpush1.msra.mxu0 %v2909_v40  ;;  %1158 = vmatpush1.msra.mxu1 %v2911_v41  ;;  %3911 = vst [vmem:[#allocation14_spill] sm:$0xff] %v3268_v37 }
 0x27f   :  { %1088 = vmatprep.subr.mxu0 %v2917_v42  ;;  %1159 = vmatprep.subr.mxu1 %v2919_v43 }
 0x280   :  { %1089 = vmatpush1.msra.mxu0 %v2925_v44  ;;  %1160 = vmatpush1.msra.mxu1 %v2927_v45 }
 0x281   :  { %1090 = vmatprep.subr.mxu0 %v2932_v46  ;;  %1161 = vmatprep.subr.mxu1 %v2934_v47 }
 0x282   :  { %1091 = vmatpush1.msra.mxu0 %v2942_v48  ;;  %1162 = vmatpush1.msra.mxu1 %v2944_v49 }
 0x283   :  { %1092 = vmatprep.subr.mxu0 %v2950_v51  ;;  %1163 = vmatprep.subr.mxu1 %v2952_v52 }
 0x284   :  { %1093 = vmatpush1.msra.mxu0 %v2957_v53  ;;  %1164 = vmatpush1.msra.mxu1 %v2959_v54 }
 0x285   :  { %1094 = vmatprep.subr.mxu0 %v2967_v55  ;;  %1165 = vmatprep.subr.mxu1 %v2969_v56 }
 0x286   :  { %1095 = vmatpush1.msra.mxu0 %v2975_v58  ;;  %1166 = vmatpush1.msra.mxu1 %v2977_v59 }
 0x287   :  { %1096 = vmatprep.subr.mxu0 %v3890_v12  ;;  %1167 = vmatprep.subr.mxu1 %v3891_v13 }
 0x288   :  { %1097 = vmatpush1.msra.mxu0 %v3892_v16  ;;  %1168 = vmatpush1.msra.mxu1 %v3893_v17 }
 0x289   :  { %1098 = vmatprep.subr.mxu0 %v3894_v18  ;;  %1169 = vmatprep.subr.mxu1 %v3895_v19 }
 0x28a   :  { %1099 = vmatpush1.msra.mxu0 %v3896_v20  ;;  %1170 = vmatpush1.msra.mxu1 %v3897_v21 }
 0x28b   :  { %1100 = vmatprep.subr.mxu0 %v3898_v22  ;;  %1171 = vmatprep.subr.mxu1 %v3899_v23 }
 0x28c   :  { %1101 = vmatpush1.msra.mxu0 %v3900_v25  ;;  %1172 = vmatpush1.msra.mxu1 %v3901_v26 }
 0x28d   :  { %1102 = vmatprep.subr.mxu0 %v3902_v27  ;;  %1173 = vmatprep.subr.mxu1 %v3903_v28 }
 0x28e   :  { %1103 = vmatpush1.msra.mxu0 %v3904_v29  ;;  %1174 = vmatpush1.msra.mxu1 %v3905_v30 }
 0x28f   :  { %1104 = vmatprep.subr.mxu0 %v3906_v32  ;;  %1175 = vmatprep.subr.mxu1 %v3907_v33 }
 0x290   :  { %1105 = vmatpush1.msra.mxu0 %v3908_v34  ;;  %1138 = vmatprep.mubr.f32.mxu0 %v3909_v35 }
 0x291   :  { %1176 = vmatpush1.msra.mxu1 %v3910_v36  ;;  %1209 = vmatprep.mubr.f32.mxu1 %v3909_v35 }
 0x292   :  { %1267 = vmatprep.subr.mxu0 %v3268_v37  ;;  %1338 = vmatprep.subr.mxu1 %v3271_v7 }
 0x331   :  { %v947_v6 = vpop.f32.mrf.mxu0  ;;  %v1018_v15 = vpop.f32.mrf.mxu1 }
 0x332   :  { %v1027_v9 = vrot.slane %v947_v6, 4  ;;  %v1029_v62 = vrot.slane %v1018_v15, 4 }
 0x333   :  { %v949_v0 = vpop.f32.mrf.mxu0  ;;  %v1020_v4 = vpop.f32.mrf.mxu1 }
 0x334   :  { %v1035_v57 = vadd.f32 %v1027_v9, %v874_v1  ;;  %v1028_v2 = vrot.slane %v949_v0, 4  ;;  %v1037_v8 = vadd.f32 %v1029_v62, %v876_v24  ;;  %v1030_v3 = vrot.slane %v1020_v4, 4 }
 0x336   :  { %v2268_v50 = vmul.f32 -1.442695, %v1035_v57  ;;  %v1036_v31 = vadd.f32 %v1028_v2, %v875_v5  ;;  %v2270_v11 = vmul.f32 -1.442695, %v1037_v8  ;;  %v1038_v60 = vadd.f32 %v1030_v3, %v877_v14  ;;  %v3278_v8 = vld [vmem:[#allocation9 + $0x1e0] sm:$0xff]  ;;  %v3284_v3 = vld [vmem:[#allocation9 + $0x1c8] sm:$0xff] }
 0x337   :  { %v1059_v2 = vrot.slane %v3201_v61, 6  ;;  %v3281_v61 = vld [vmem:[#allocation9 + $0x1f0] sm:$0xff]  ;;  %v3290_v14 = vld [vmem:[#allocation9 + $0x1c0] sm:$0xff] }
 0x338   :  { %2410 = vpow2.f32 %v2268_v50  ;;  %v2269_v10 = vmul.f32 -1.442695, %v1036_v31 }
 0x33a   :  { %2412 = vpow2.f32 %v2269_v10 }
 0x33b   :  { %2414 = vpow2.f32 %v2270_v11  ;;  %v3287_v11 = vld [vmem:[#allocation9 + $0x1d8] sm:$0xff] }
 0x345   :  { %v2411_v63 = vpop.eup %2410 }
 0x346   :  { %v1048_v6 = vadd.f32 1.0, %v2411_v63  ;;  %v3293_v63 = vld [vmem:[#allocation9 + $0x1d0] sm:$0xff] }
 0x347   :  { %v2413_v7 = vpop.eup %2412 }
 0x348   :  { %2416 = vrcp.f32 %v1048_v6  ;;  %v1049_v9 = vadd.f32 1.0, %v2413_v7  ;;  %v2415_v1 = vpop.eup %2414  ;;  %v3299_v6 = vld [vmem:[#allocation9 + $0x1b8] sm:$0xff] }
 0x349   :  { %2418 = vtanh.f32 %v1038_v60  ;;  %v1050_v50 = vadd.f32 1.0, %v2415_v1  ;;  %v3296_v60 = vld [vmem:[#allocation9 + $0x1a8] sm:$0xff]  ;;  %v3305_v1 = vld [vmem:[#allocation9 + $0x1b0] sm:$0xff] }
 0x34a   :  { %2420 = vrcp.f32 %v1049_v9  ;;  %v3302_v9 = vld [vmem:[#allocation9 + $0x1a0] sm:$0xff] }
 0x34b   :  { %2422 = vrcp.f32 %v1050_v50  ;;  %v3320_v50 = vld [vmem:[#allocation9 + $0x168] sm:$0xff] }
 0x355   :  { %v2417_v0 = vpop.eup %2416 }
 0x356   :  { %v2419_v57 = vpop.eup %2418 }
 0x357   :  { %v2421_v5 = vpop.eup %2420  ;;  %v1062_v15 = vmul.f32 %v2419_v57, %v2417_v0  ;;  %v3308_v0 = vld [vmem:[#allocation9 + $0x188] sm:$0xff]  ;;  %v3311_v57 = vld [vmem:[#allocation9 + $0x198] sm:$0xff] }
 0x358   :  { %v1061_v31 = vmul.f32 %v2421_v5, %v1059_v2  ;;  %v2423_v62 = vpop.eup %2422  ;;  %v3314_v2 = vld [vmem:[#allocation9 + $0x180] sm:$0xff]  ;;  %v3317_v5 = vld [vmem:[#allocation9 + $0x190] sm:$0xff] }
 0x35a   :  { %v3275_v10 = vadd.f32 %v1062_v15, %v1061_v31  ;;  %v3323_v31 = vld [vmem:[#allocation9 + $0x178] sm:$0xff]  ;;  %v3326_v15 = vld [vmem:[#allocation9 + $0x160] sm:$0xff] }
 0x35b   :  { %3913 = vst [vmem:[#allocation16_spill] sm:$0xff] %v3323_v31 }
 0x35c   :  { %2424 = vtanh.f32 %v3275_v10 }
 0x369   :  { %v2425_v24 = vpop.eup %2424 }
 0x36a   :  { %v1065_v4 = vmul.f32 %v2425_v24, %v2423_v62  ;;  %v3329_v62 = vld [vmem:[#allocation9 + $0x170] sm:$0xff]  ;;  %v3332_v24 = vld [vmem:[#allocation9 + $0x148] sm:$0xff] }
 0x36c   :  { %1066 = vst [vmem:[#allocation4] sm:$0x30] %v1065_v4  ;;  %v1072_v7 = vrot.slane %v1065_v4, 4  ;;  %v3335_v4 = vld [vmem:[#allocation9 + $0x158] sm:$0xff] }
 0x36e   :  { %1139 = vmatmul.mubr.f32.vlgmr.msra.gmra.mxu0 %v1072_v7  ;;  %1210 = vmatmul.mubr.f32.vlgmr.msra.gmra.mxu1 %v1072_v7  ;;  %v3338_v7 = vld [vmem:[#allocation9 + $0x140] sm:$0xff] }
 0x36f   :  { %1268 = vmatpush1.msra.mxu0 %v3278_v8  ;;  %1339 = vmatpush1.msra.mxu1 %v3281_v61 }
 0x370   :  { %1269 = vmatprep.subr.mxu0 %v3284_v3  ;;  %1340 = vmatprep.subr.mxu1 %v3287_v11 }
 0x371   :  { %1270 = vmatpush1.msra.mxu0 %v3290_v14  ;;  %1341 = vmatpush1.msra.mxu1 %v3293_v63 }
 0x372   :  { %1271 = vmatprep.subr.mxu0 %v3296_v60  ;;  %1342 = vmatprep.subr.mxu1 %v3299_v6 }
 0x373   :  { %1272 = vmatpush1.msra.mxu0 %v3302_v9  ;;  %1343 = vmatpush1.msra.mxu1 %v3305_v1 }
 0x374   :  { %1273 = vmatprep.subr.mxu0 %v3308_v0  ;;  %1344 = vmatprep.subr.mxu1 %v3311_v57 }
 0x375   :  { %1274 = vmatpush1.msra.mxu0 %v3314_v2  ;;  %1345 = vmatpush1.msra.mxu1 %v3317_v5 }
 0x376   :  { %1275 = vmatprep.subr.mxu0 %v3320_v50  ;;  %1346 = vmatprep.subr.mxu1 %v3323_v31  ;;  %v3341_v31 = vld [vmem:[#allocation9 + $0x150] sm:$0xff] }
 0x377   :  { %1276 = vmatpush1.msra.mxu0 %v3326_v15  ;;  %1347 = vmatpush1.msra.mxu1 %v3329_v62 }
 0x378   :  { %1277 = vmatprep.subr.mxu0 %v3332_v24  ;;  %1348 = vmatprep.subr.mxu1 %v3335_v4 }
 0x379   :  { %1278 = vmatpush1.msra.mxu0 %v3338_v7  ;;  %1349 = vmatpush1.msra.mxu1 %v3341_v31 }
 0x37a   :  { %1279 = vmatprep.subr.mxu0 %v2902_v38  ;;  %1350 = vmatprep.subr.mxu1 %v2904_v39  ;;  %v3914_v38 = vld [vmem:[#allocation15_spill] sm:$0xff] }
 0x37b   :  { %1280 = vmatpush1.msra.mxu0 %v2909_v40  ;;  %1351 = vmatpush1.msra.mxu1 %v2911_v41  ;;  %v1067_v41 = vld [vmem:[#allocation3 + $0x30] sm:$0xc0] }
 0x37c   :  { %1281 = vmatprep.subr.mxu0 %v2917_v42  ;;  %1352 = vmatprep.subr.mxu1 %v2919_v43 }
 0x37d   :  { %1282 = vmatpush1.msra.mxu0 %v2925_v44  ;;  %1353 = vmatpush1.msra.mxu1 %v2927_v45  ;;  %v1068_v45 = vld [vmem:[#allocation3] sm:$0xc0] }
 0x37e   :  { %1283 = vmatprep.subr.mxu0 %v2932_v46  ;;  %1354 = vmatprep.subr.mxu1 %v2934_v47 }
 0x37f   :  { %1284 = vmatpush1.msra.mxu0 %v2942_v48  ;;  %1355 = vmatpush1.msra.mxu1 %v2944_v49 }
 0x380   :  { %1285 = vmatprep.subr.mxu0 %v2950_v51  ;;  %1356 = vmatprep.subr.mxu1 %v2952_v52  ;;  %v1069_v52 = vld [vmem:[#allocation3 + $0x18] sm:$0xc0] }
 0x381   :  { %1286 = vmatpush1.msra.mxu0 %v2957_v53  ;;  %1357 = vmatpush1.msra.mxu1 %v2959_v54 }
 0x382   :  { %1287 = vmatprep.subr.mxu0 %v2967_v55  ;;  %1358 = vmatprep.subr.mxu1 %v2969_v56 }
 0x383   :  { %1288 = vmatpush1.msra.mxu0 %v2975_v58  ;;  %1359 = vmatpush1.msra.mxu1 %v2977_v59  ;;  %v1070_v58 = vld [vmem:[#allocation3 + $0x10] sm:$0xc0] }
 0x384   :  { %1289 = vmatprep.subr.mxu0 %v3890_v12  ;;  %1360 = vmatprep.subr.mxu1 %v3891_v13 }
 0x385   :  { %1290 = vmatpush1.msra.mxu0 %v3892_v16  ;;  %1361 = vmatpush1.msra.mxu1 %v3893_v17 }
 0x386   :  { %1291 = vmatprep.subr.mxu0 %v3894_v18  ;;  %1362 = vmatprep.subr.mxu1 %v3895_v19 }
 0x387   :  { %1292 = vmatpush1.msra.mxu0 %v3896_v20  ;;  %1363 = vmatpush1.msra.mxu1 %v3897_v21  ;;  %v1252_v21 = vrot.slane %v3275_v10, 6  ;;  %v3420_v10 = vld [vmem:[#allocation9 + $0x120] sm:$0xff] }
 0x388   :  { %1293 = vmatprep.subr.mxu0 %v3898_v22  ;;  %1364 = vmatprep.subr.mxu1 %v3899_v23 }
 0x389   :  { %1294 = vmatpush1.msra.mxu0 %v3900_v25  ;;  %1365 = vmatpush1.msra.mxu1 %v3901_v26 }
 0x38a   :  { %1295 = vmatprep.subr.mxu0 %v3902_v27  ;;  %1366 = vmatprep.subr.mxu1 %v3903_v28 }
 0x38b   :  { %1296 = vmatpush1.msra.mxu0 %v3904_v29  ;;  %1367 = vmatpush1.msra.mxu1 %v3905_v30 }
 0x38c   :  { %1297 = vmatprep.subr.mxu0 %v3906_v32  ;;  %1368 = vmatprep.subr.mxu1 %v3907_v33  ;;  %v3915_v33 = vld [vmem:[#allocation16_spill] sm:$0xff] }
 0x38d   :  { %1298 = vmatpush1.msra.mxu0 %v3908_v34  ;;  %1331 = vmatprep.mubr.f32.mxu0 %v3909_v35  ;;  %v3414_v34 = vld [vmem:[#allocation9 + $0x128] sm:$0xff] }
 0x38e   :  { %1369 = vmatpush1.msra.mxu1 %v3910_v36  ;;  %1402 = vmatprep.mubr.f32.mxu1 %v3909_v35  ;;  %v3417_v36 = vld [vmem:[#allocation9 + $0x138] sm:$0xff] }
 0x38f   :  { %1445 = vmatprep.subr.mxu0 %v3268_v37  ;;  %1516 = vmatprep.subr.mxu1 %v3914_v38 }
 0x42e   :  { %v1140_v39 = vpop.f32.mrf.mxu0  ;;  %v1211_v48 = vpop.f32.mrf.mxu1 }
 0x42f   :  { %v1220_v40 = vrot.slane %v1140_v39, 2  ;;  %v1222_v51 = vrot.slane %v1211_v48, 2  ;;  %v3423_v39 = vld [vmem:[#allocation9 + $0x130] sm:$0xff]  ;;  %v3450_v48 = vld [vmem:[#allocation9 + $0xc8] sm:$0xff] }
 0x430   :  { %v1142_v42 = vpop.f32.mrf.mxu0  ;;  %v1213_v53 = vpop.f32.mrf.mxu1 }
 0x431   :  { %v1228_v43 = vadd.f32 %v1220_v40, %v1067_v41  ;;  %v1221_v44 = vrot.slane %v1142_v42, 2  ;;  %v1230_v54 = vadd.f32 %v1222_v51, %v1069_v52  ;;  %v1223_v55 = vrot.slane %v1213_v53, 2  ;;  %v3426_v40 = vld [vmem:[#allocation9 + $0x108] sm:$0xff]  ;;  %v3429_v41 = vld [vmem:[#allocation9 + $0x118] sm:$0xff]  ;;  %v3432_v42 = vld [vmem:[#allocation9 + $0x100] sm:$0xff] }
 0x432   :  { %v3456_v51 = vld [vmem:[#allocation9 + $0xc0] sm:$0xff]  ;;  %v3459_v52 = vld [vmem:[#allocation9 + $0xd0] sm:$0xff]  ;;  %v3462_v53 = vld [vmem:[#allocation9 + $0xa8] sm:$0xff] }
 0x433   :  { %v2271_v46 = vmul.f32 -1.442695, %v1228_v43  ;;  %v1229_v47 = vadd.f32 %v1221_v44, %v1068_v45  ;;  %v2273_v56 = vmul.f32 -1.442695, %v1230_v54  ;;  %v1231_v12 = vadd.f32 %v1223_v55, %v1070_v58  ;;  %v3435_v43 = vld [vmem:[#allocation9 + $0x110] sm:$0xff]  ;;  %v3438_v44 = vld [vmem:[#allocation9 + $0xe8] sm:$0xff] }
 0x434   :  { %v3441_v45 = vld [vmem:[#allocation9 + $0xf8] sm:$0xff]  ;;  %v3468_v55 = vld [vmem:[#allocation9 + $0xa0] sm:$0xff]  ;;  %v3474_v58 = vld [vmem:[#allocation9 + $0x88] sm:$0xff] }
 0x435   :  { %2426 = vpow2.f32 %v2271_v46  ;;  %v2272_v49 = vmul.f32 -1.442695, %v1229_v47  ;;  %v3444_v46 = vld [vmem:[#allocation9 + $0xe0] sm:$0xff]  ;;  %v3447_v47 = vld [vmem:[#allocation9 + $0xf0] sm:$0xff]  ;;  %v3465_v54 = vld [vmem:[#allocation9 + $0xb8] sm:$0xff]  ;;  %3916 = vst [vmem:[#allocation17_spill] sm:$0xff] %v3474_v58 }
 0x437   :  { %2428 = vpow2.f32 %v2272_v49  ;;  %v3453_v49 = vld [vmem:[#allocation9 + $0xd8] sm:$0xff] }
 0x438   :  { %2430 = vpow2.f32 %v2273_v56  ;;  %v3471_v56 = vld [vmem:[#allocation9 + $0xb0] sm:$0xff] }
 0x442   :  { %v2427_v59 = vpop.eup %2426 }
 0x443   :  { %v1241_v13 = vadd.f32 1.0, %v2427_v59  ;;  %v3477_v59 = vld [vmem:[#allocation9 + $0x98] sm:$0xff] }
 0x444   :  { %v2429_v16 = vpop.eup %2428  ;;  %3917 = vst [vmem:[#allocation18_spill] sm:$0xff] %v3477_v59 }
 0x445   :  { %2432 = vrcp.f32 %v1241_v13  ;;  %v1242_v17 = vadd.f32 1.0, %v2429_v16  ;;  %v2431_v18 = vpop.eup %2430  ;;  %v3483_v13 = vld [vmem:[#allocation9 + $0x90] sm:$0xff]  ;;  %v3486_v16 = vld [vmem:[#allocation9 + $0x68] sm:$0xff] }
 0x446   :  { %2434 = vtanh.f32 %v1231_v12  ;;  %v1243_v23 = vadd.f32 1.0, %v2431_v18  ;;  %v3480_v12 = vld [vmem:[#allocation9 + $0x80] sm:$0xff]  ;;  %3919 = vst [vmem:[#allocation20_spill] sm:$0xff] %v3483_v13  ;;  %3920 = vst [vmem:[#allocation21_spill] sm:$0xff] %v3486_v16 }
 0x447   :  { %2436 = vrcp.f32 %v1242_v17  ;;  %3918 = vst [vmem:[#allocation19_spill] sm:$0xff] %v3480_v12  ;;  %v3489_v17 = vld [vmem:[#allocation9 + $0x78] sm:$0xff]  ;;  %v3492_v18 = vld [vmem:[#allocation9 + $0x60] sm:$0xff] }
 0x448   :  { %2438 = vrcp.f32 %v1243_v23  ;;  %3921 = vst [vmem:[#allocation22_spill] sm:$0xff] %v3489_v17  ;;  %3922 = vst [vmem:[#allocation23_spill] sm:$0xff] %v3492_v18  ;;  %v3507_v23 = vld [vmem:[#allocation9 + $0x50] sm:$0xff] }
 0x449   :  { %3927 = vst [vmem:[#allocation28_spill] sm:$0xff] %v3507_v23 }
 0x452   :  { %v2433_v19 = vpop.eup %2432 }
 0x453   :  { %v2435_v20 = vpop.eup %2434 }
 0x454   :  { %v2437_v22 = vpop.eup %2436  ;;  %v1255_v26 = vmul.f32 %v2435_v20, %v2433_v19  ;;  %v3495_v19 = vld [vmem:[#allocation9 + $0x70] sm:$0xff]  ;;  %v3498_v20 = vld [vmem:[#allocation9 + $0x48] sm:$0xff] }
 0x455   :  { %v1254_v25 = vmul.f32 %v2437_v22, %v1252_v21  ;;  %v2439_v28 = vpop.eup %2438  ;;  %3923 = vst [vmem:[#allocation24_spill] sm:$0xff] %v3495_v19  ;;  %3924 = vst [vmem:[#allocation25_spill] sm:$0xff] %v3498_v20  ;;  %v3501_v21 = vld [vmem:[#allocation9 + $0x58] sm:$0xff]  ;;  %v3504_v22 = vld [vmem:[#allocation9 + $0x40] sm:$0xff] }
 0x456   :  { %3925 = vst [vmem:[#allocation26_spill] sm:$0xff] %v3501_v21  ;;  %3926 = vst [vmem:[#allocation27_spill] sm:$0xff] %v3504_v22 }
 0x457   :  { %v3389_v27 = vadd.f32 %v1255_v26, %v1254_v25  ;;  %v3510_v25 = vld [vmem:[#allocation9 + $0x28] sm:$0xff]  ;;  %v3513_v26 = vld [vmem:[#allocation9 + $0x38] sm:$0xff] }
 0x458   :  { %3928 = vst [vmem:[#allocation29_spill] sm:$0xff] %v3510_v25  ;;  %3929 = vst [vmem:[#allocation30_spill] sm:$0xff] %v3513_v26 }
 0x459   :  { %2440 = vtanh.f32 %v3389_v27 }
 0x466   :  { %v2441_v29 = vpop.eup %2440 }
 0x467   :  { %v1258_v30 = vmul.f32 %v2441_v29, %v2439_v28  ;;  %v3516_v28 = vld [vmem:[#allocation9 + $0x20] sm:$0xff]  ;;  %v3519_v29 = vld [vmem:[#allocation9 + $0x30] sm:$0xff] }
 0x468   :  { %3930 = vst [vmem:[#allocation31_spill] sm:$0xff] %v3516_v28  ;;  %3931 = vst [vmem:[#allocation32_spill] sm:$0xff] %v3519_v29 }
 0x469   :  { %1259 = vst [vmem:[#allocation4] sm:$0xc0] %v1258_v30  ;;  %v1265_v32 = vrot.slane %v1258_v30, 6  ;;  %v3522_v30 = vld [vmem:[#allocation9 + $0x8] sm:$0xff] }
 0x46a   :  { %3932 = vst [vmem:[#allocation33_spill] sm:$0xff] %v3522_v30 }
 0x46b   :  { %1332 = vmatmul.mubr.f32.vlgmr.msra.gmra.mxu0 %v1265_v32  ;;  %1403 = vmatmul.mubr.f32.vlgmr.msra.gmra.mxu1 %v1265_v32  ;;  %v3525_v32 = vld [vmem:[#allocation9 + $0x18] sm:$0xff] }
 0x46c   :  { %1446 = vmatpush1.msra.mxu0 %v3278_v8  ;;  %1517 = vmatpush1.msra.mxu1 %v3281_v61  ;;  %3933 = vst [vmem:[#allocation34_spill] sm:$0xff] %v3525_v32 }
 0x46d   :  { %1447 = vmatprep.subr.mxu0 %v3284_v3  ;;  %1518 = vmatprep.subr.mxu1 %v3287_v11 }
 0x46e   :  { %1448 = vmatpush1.msra.mxu0 %v3290_v14  ;;  %1519 = vmatpush1.msra.mxu1 %v3293_v63 }
 0x46f   :  { %1449 = vmatprep.subr.mxu0 %v3296_v60  ;;  %1520 = vmatprep.subr.mxu1 %v3299_v6 }
 0x470   :  { %1450 = vmatpush1.msra.mxu0 %v3302_v9  ;;  %1521 = vmatpush1.msra.mxu1 %v3305_v1 }
 0x471   :  { %1451 = vmatprep.subr.mxu0 %v3308_v0  ;;  %1522 = vmatprep.subr.mxu1 %v3311_v57 }
 0x472   :  { %1452 = vmatpush1.msra.mxu0 %v3314_v2  ;;  %1523 = vmatpush1.msra.mxu1 %v3317_v5 }
 0x473   :  { %1453 = vmatprep.subr.mxu0 %v3320_v50  ;;  %1524 = vmatprep.subr.mxu1 %v3915_v33 }
 0x474   :  { %1454 = vmatpush1.msra.mxu0 %v3326_v15  ;;  %1525 = vmatpush1.msra.mxu1 %v3329_v62 }
 0x475   :  { %1455 = vmatprep.subr.mxu0 %v3332_v24  ;;  %1526 = vmatprep.subr.mxu1 %v3335_v4 }
 0x476   :  { %1456 = vmatpush1.msra.mxu0 %v3338_v7  ;;  %1527 = vmatpush1.msra.mxu1 %v3341_v31 }
 0x477   :  { %1457 = vmatprep.subr.mxu0 %v3414_v34  ;;  %1528 = vmatprep.subr.mxu1 %v3417_v36 }
 0x478   :  { %1458 = vmatpush1.msra.mxu0 %v3420_v10  ;;  %1529 = vmatpush1.msra.mxu1 %v3423_v39 }
 0x479   :  { %1459 = vmatprep.subr.mxu0 %v3426_v40  ;;  %1530 = vmatprep.subr.mxu1 %v3429_v41 }
 0x47a   :  { %1460 = vmatpush1.msra.mxu0 %v3432_v42  ;;  %1531 = vmatpush1.msra.mxu1 %v3435_v43 }
 0x47b   :  { %1461 = vmatprep.subr.mxu0 %v3438_v44  ;;  %1532 = vmatprep.subr.mxu1 %v3441_v45 }
 0x47c   :  { %1462 = vmatpush1.msra.mxu0 %v3444_v46  ;;  %1533 = vmatpush1.msra.mxu1 %v3447_v47 }
 0x47d   :  { %1463 = vmatprep.subr.mxu0 %v3450_v48  ;;  %1534 = vmatprep.subr.mxu1 %v3453_v49 }
 0x47e   :  { %1464 = vmatpush1.msra.mxu0 %v3456_v51  ;;  %1535 = vmatpush1.msra.mxu1 %v3459_v52 }
 0x47f   :  { %1465 = vmatprep.subr.mxu0 %v3462_v53  ;;  %1536 = vmatprep.subr.mxu1 %v3465_v54 }
 0x480   :  { %1466 = vmatpush1.msra.mxu0 %v3468_v55  ;;  %1537 = vmatpush1.msra.mxu1 %v3471_v56 }
 0x481   :  { %1467 = vmatprep.subr.mxu0 %v3474_v58  ;;  %1538 = vmatprep.subr.mxu1 %v3477_v59 }
 0x482   :  { %1468 = vmatpush1.msra.mxu0 %v3480_v12  ;;  %1539 = vmatpush1.msra.mxu1 %v3483_v13 }
 0x483   :  { %1469 = vmatprep.subr.mxu0 %v3486_v16  ;;  %1540 = vmatprep.subr.mxu1 %v3489_v17 }
 0x484   :  { %1470 = vmatpush1.msra.mxu0 %v3492_v18  ;;  %1541 = vmatpush1.msra.mxu1 %v3495_v19  ;;  %v1262_v19 = vld [vmem:[#allocation3 + $0x28] sm:$0x3] }
 0x485   :  { %1471 = vmatprep.subr.mxu0 %v3498_v20  ;;  %1542 = vmatprep.subr.mxu1 %v3501_v21 }
 0x486   :  { %1472 = vmatpush1.msra.mxu0 %v3504_v22  ;;  %1543 = vmatpush1.msra.mxu1 %v3507_v23 }
 0x487   :  { %1473 = vmatprep.subr.mxu0 %v3510_v25  ;;  %1544 = vmatprep.subr.mxu1 %v3513_v26  ;;  %v3528_v25 = vld [vmem:[#allocation9] sm:$0xff]  ;;  %v3532_v26 = vld [vmem:[#allocation9 + $0x10] sm:$0xff] }
 0x488   :  { %1474 = vmatpush1.msra.mxu0 %v3516_v28  ;;  %1545 = vmatpush1.msra.mxu1 %v3519_v29  ;;  %3934 = vst [vmem:[#allocation35_spill] sm:$0xff] %v3528_v25  ;;  %3935 = vst [vmem:[#allocation16_spill] sm:$0xff] %v3532_v26 }
 0x489   :  { %1475 = vmatprep.subr.mxu0 %v3522_v30  ;;  %1546 = vmatprep.subr.mxu1 %v3525_v32  ;;  %v1260_v30 = vld [vmem:[#allocation3 + $0x8] sm:$0x3]  ;;  %v1261_v32 = vld [vmem:[#allocation3 + $0x20] sm:$0x3] }
 0x48a   :  { %1476 = vmatpush1.msra.mxu0 %v3528_v25  ;;  %1509 = vmatprep.mubr.f32.mxu0 %v3909_v35 }
 0x48b   :  { %1547 = vmatpush1.msra.mxu1 %v3532_v26  ;;  %1580 = vmatprep.mubr.f32.mxu1 %v3909_v35  ;;  %v1263_v35 = vld [vmem:[#allocation3 + $0x38] sm:$0x3] }
 0x48c   :  { %1638 = vmatprep.subr.mxu0 %v3268_v37  ;;  %1709 = vmatprep.subr.mxu1 %v3914_v38 }
 0x52b   :  { %v1333_v29 = vpop.f32.mrf.mxu0  ;;  %v1404_v20 = vpop.f32.mrf.mxu1 }
 0x52c   :  { %v1409_v28 = vadd.f32 %v1333_v29, %v1260_v30  ;;  %v1411_v18 = vadd.f32 %v1404_v20, %v1262_v19 }
 0x52d   :  { %v1335_v23 = vpop.f32.mrf.mxu0  ;;  %v1406_v26 = vpop.f32.mrf.mxu1 }
 0x52e   :  { %v2274_v22 = vmul.f32 -1.442695, %v1409_v28  ;;  %v1410_v21 = vadd.f32 %v1335_v23, %v1261_v32  ;;  %v2276_v17 = vmul.f32 -1.442695, %v1411_v18  ;;  %v1412_v37 = vadd.f32 %v1406_v26, %v1263_v35  ;;  %v3940_v26 = vld [vmem:[#allocation24_spill] sm:$0xff]  ;;  %v3941_v32 = vld [vmem:[#allocation25_spill] sm:$0xff] }
 0x530   :  { %2442 = vpow2.f32 %v2274_v22  ;;  %v2275_v25 = vmul.f32 -1.442695, %v1410_v21  ;;  %v1433_v21 = vrot.slane %v3389_v27, 6  ;;  %v3938_v27 = vld [vmem:[#allocation22_spill] sm:$0xff] }
 0x532   :  { %2444 = vpow2.f32 %v2275_v25 }
 0x533   :  { %2446 = vpow2.f32 %v2276_v17  ;;  %v3939_v17 = vld [vmem:[#allocation23_spill] sm:$0xff] }
 0x53d   :  { %v2443_v16 = vpop.eup %2442 }
 0x53e   :  { %v1422_v13 = vadd.f32 1.0, %v2443_v16 }
 0x53f   :  { %v2445_v38 = vpop.eup %2444 }
 0x540   :  { %2448 = vrcp.f32 %v1422_v13  ;;  %v1423_v29 = vadd.f32 1.0, %v2445_v38  ;;  %v2447_v28 = vpop.eup %2446  ;;  %v3937_v38 = vld [vmem:[#allocation21_spill] sm:$0xff] }
 0x541   :  { %2450 = vtanh.f32 %v1412_v37  ;;  %v1424_v30 = vadd.f32 1.0, %v2447_v28  ;;  %v3936_v37 = vld [vmem:[#allocation20_spill] sm:$0xff]  ;;  %v3943_v28 = vld [vmem:[#allocation27_spill] sm:$0xff] }
 0x542   :  { %2452 = vrcp.f32 %v1423_v29  ;;  %v3942_v29 = vld [vmem:[#allocation26_spill] sm:$0xff] }
 0x543   :  { %2454 = vrcp.f32 %v1424_v30  ;;  %v3948_v30 = vld [vmem:[#allocation32_spill] sm:$0xff] }
 0x54d   :  { %v2449_v23 = vpop.eup %2448 }
 0x54e   :  { %v2451_v22 = vpop.eup %2450 }
 0x54f   :  { %v2453_v25 = vpop.eup %2452  ;;  %v1436_v20 = vmul.f32 %v2451_v22, %v2449_v23  ;;  %v3944_v23 = vld [vmem:[#allocation28_spill] sm:$0xff]  ;;  %v3945_v22 = vld [vmem:[#allocation29_spill] sm:$0xff] }
 0x550   :  { %v1435_v19 = vmul.f32 %v2453_v25, %v1433_v21  ;;  %v2455_v35 = vpop.eup %2454  ;;  %v3946_v21 = vld [vmem:[#allocation30_spill] sm:$0xff]  ;;  %v3947_v25 = vld [vmem:[#allocation31_spill] sm:$0xff] }
 0x552   :  { %v3539_v18 = vadd.f32 %v1436_v20, %v1435_v19  ;;  %v3949_v19 = vld [vmem:[#allocation33_spill] sm:$0xff]  ;;  %v3950_v20 = vld [vmem:[#allocation34_spill] sm:$0xff] }
 0x554   :  { %2456 = vtanh.f32 %v3539_v18 }
 0x561   :  { %v2457_v16 = vpop.eup %2456 }
 0x562   :  { %v1439_v13 = vmul.f32 %v2457_v16, %v2455_v35  ;;  %v3951_v35 = vld [vmem:[#allocation35_spill] sm:$0xff]  ;;  %v3952_v16 = vmov 0.0  }
 0x564   :  { %1440 = vst [vmem:[#allocation4 + $0x8] sm:$0x3] %v1439_v13  ;;  %1510 = vmatmul.mubr.f32.vlgmr.msra.gmra.mxu0 %v1439_v13  ;;  %1581 = vmatmul.mubr.f32.vlgmr.msra.gmra.mxu1 %v1439_v13  ;;  %v3953_v13 = vld [vmem:[#allocation16_spill] sm:$0xff] }
 0x565   :  { %1639 = vmatpush1.msra.mxu0 %v3278_v8  ;;  %1710 = vmatpush1.msra.mxu1 %v3281_v61 }
 0x566   :  { %1640 = vmatprep.subr.mxu0 %v3284_v3  ;;  %1711 = vmatprep.subr.mxu1 %v3287_v11 }
 0x567   :  { %1641 = vmatpush1.msra.mxu0 %v3290_v14  ;;  %1712 = vmatpush1.msra.mxu1 %v3293_v63 }
 0x568   :  { %1642 = vmatprep.subr.mxu0 %v3296_v60  ;;  %1713 = vmatprep.subr.mxu1 %v3299_v6 }
 0x569   :  { %1643 = vmatpush1.msra.mxu0 %v3302_v9  ;;  %1714 = vmatpush1.msra.mxu1 %v3305_v1 }
 0x56a   :  { %1644 = vmatprep.subr.mxu0 %v3308_v0  ;;  %1715 = vmatprep.subr.mxu1 %v3311_v57 }
 0x56b   :  { %1645 = vmatpush1.msra.mxu0 %v3314_v2  ;;  %1716 = vmatpush1.msra.mxu1 %v3317_v5 }
 0x56c   :  { %1646 = vmatprep.subr.mxu0 %v3320_v50  ;;  %1717 = vmatprep.subr.mxu1 %v3915_v33 }
 0x56d   :  { %1647 = vmatpush1.msra.mxu0 %v3326_v15  ;;  %1718 = vmatpush1.msra.mxu1 %v3329_v62 }
 0x56e   :  { %1648 = vmatprep.subr.mxu0 %v3332_v24  ;;  %1719 = vmatprep.subr.mxu1 %v3335_v4 }
 0x56f   :  { %1649 = vmatpush1.msra.mxu0 %v3338_v7  ;;  %1720 = vmatpush1.msra.mxu1 %v3341_v31 }
 0x570   :  { %1650 = vmatprep.subr.mxu0 %v3414_v34  ;;  %1721 = vmatprep.subr.mxu1 %v3417_v36 }
 0x571   :  { %1651 = vmatpush1.msra.mxu0 %v3420_v10  ;;  %1722 = vmatpush1.msra.mxu1 %v3423_v39 }
 0x572   :  { %1652 = vmatprep.subr.mxu0 %v3426_v40  ;;  %1723 = vmatprep.subr.mxu1 %v3429_v41 }
 0x573   :  { %1653 = vmatpush1.msra.mxu0 %v3432_v42  ;;  %1724 = vmatpush1.msra.mxu1 %v3435_v43 }
 0x574   :  { %1654 = vmatprep.subr.mxu0 %v3438_v44  ;;  %1725 = vmatprep.subr.mxu1 %v3441_v45 }
 0x575   :  { %1655 = vmatpush1.msra.mxu0 %v3444_v46  ;;  %1726 = vmatpush1.msra.mxu1 %v3447_v47 }
 0x576   :  { %1656 = vmatprep.subr.mxu0 %v3450_v48  ;;  %1727 = vmatprep.subr.mxu1 %v3453_v49 }
 0x577   :  { %1657 = vmatpush1.msra.mxu0 %v3456_v51  ;;  %1728 = vmatpush1.msra.mxu1 %v3459_v52 }
 0x578   :  { %1658 = vmatprep.subr.mxu0 %v3462_v53  ;;  %1729 = vmatprep.subr.mxu1 %v3465_v54 }
 0x579   :  { %1659 = vmatpush1.msra.mxu0 %v3468_v55  ;;  %1730 = vmatpush1.msra.mxu1 %v3471_v56 }
 0x57a   :  { %1660 = vmatprep.subr.mxu0 %v3474_v58  ;;  %1731 = vmatprep.subr.mxu1 %v3477_v59 }
 0x57b   :  { %1661 = vmatpush1.msra.mxu0 %v3480_v12  ;;  %1732 = vmatpush1.msra.mxu1 %v3936_v37 }
 0x57c   :  { %1662 = vmatprep.subr.mxu0 %v3937_v38  ;;  %1733 = vmatprep.subr.mxu1 %v3938_v27  ;;  %v1443_v27 = vld [vmem:[#allocation3 + $0x28] sm:$0xc] }
 0x57d   :  { %1663 = vmatpush1.msra.mxu0 %v3939_v17  ;;  %1734 = vmatpush1.msra.mxu1 %v3940_v26 }
 0x57e   :  { %1664 = vmatprep.subr.mxu0 %v3941_v32  ;;  %1735 = vmatprep.subr.mxu1 %v3942_v29  ;;  %v1442_v32 = vld [vmem:[#allocation3 + $0x20] sm:$0xc] }
 0x57f   :  { %1665 = vmatpush1.msra.mxu0 %v3943_v28  ;;  %1736 = vmatpush1.msra.mxu1 %v3944_v23  ;;  %v3954_v23 = vld [vmem:[#allocation14_spill] sm:$0xff]  ;;  %v1441_v28 = vld [vmem:[#allocation3 + $0x8] sm:$0xc] }
 0x580   :  { %1666 = vmatprep.subr.mxu0 %v3945_v22  ;;  %1737 = vmatprep.subr.mxu1 %v3946_v21  ;;  %v3955_v22 = vld [vmem:[#allocation15_spill] sm:$0xff] }
 0x581   :  { %1667 = vmatpush1.msra.mxu0 %v3947_v25  ;;  %1738 = vmatpush1.msra.mxu1 %v3948_v30 }
 0x582   :  { %1668 = vmatprep.subr.mxu0 %v3949_v19  ;;  %1739 = vmatprep.subr.mxu1 %v3950_v20 }
 0x583   :  { %1669 = vmatpush1.msra.mxu0 %v3951_v35  ;;  %1702 = vmatprep.mubr.f32.mxu0 %v3952_v16 }
 0x584   :  { %1740 = vmatpush1.msra.mxu1 %v3953_v13  ;;  %1773 = vmatprep.mubr.f32.mxu1 %v3952_v16 }
 0x585   :  { %1831 = vmatprep.subr.mxu0 %v3954_v23  ;;  %1902 = vmatprep.subr.mxu1 %v3955_v22  ;;  %v1444_v22 = vld [vmem:[#allocation3 + $0x38] sm:$0xc] }
 0x624   :  { %v1511_v21 = vpop.f32.mrf.mxu0  ;;  %v1582_v35 = vpop.f32.mrf.mxu1 }
 0x625   :  { %v1591_v25 = vrot.slane %v1511_v21, 6  ;;  %v1593_v13 = vrot.slane %v1582_v35, 6 }
 0x626   :  { %v1513_v30 = vpop.f32.mrf.mxu0  ;;  %v1584_v16 = vpop.f32.mrf.mxu1 }
 0x627   :  { %v1599_v29 = vadd.f32 %v1591_v25, %v1441_v28  ;;  %v1592_v19 = vrot.slane %v1513_v30, 6  ;;  %v1601_v38 = vadd.f32 %v1593_v13, %v1443_v27  ;;  %v1594_v23 = vrot.slane %v1584_v16, 6 }
 0x629   :  { %v2277_v20 = vmul.f32 -1.442695, %v1599_v29  ;;  %v1600_v26 = vadd.f32 %v1592_v19, %v1442_v32  ;;  %v2279_v37 = vmul.f32 -1.442695, %v1601_v38  ;;  %v1602_v21 = vadd.f32 %v1594_v23, %v1444_v22 }
 0x62b   :  { %2458 = vpow2.f32 %v2277_v20  ;;  %v2278_v17 = vmul.f32 -1.442695, %v1600_v26 }
 0x62d   :  { %2460 = vpow2.f32 %v2278_v17  ;;  %v1623_v17 = vrot.slane %v3539_v18, 6 }
 0x62e   :  { %2462 = vpow2.f32 %v2279_v37 }
 0x638   :  { %v2459_v12 = vpop.eup %2458 }
 0x639   :  { %v1612_v59 = vadd.f32 1.0, %v2459_v12 }
 0x63a   :  { %v2461_v58 = vpop.eup %2460 }
 0x63b   :  { %2464 = vrcp.f32 %v1612_v59  ;;  %v1613_v28 = vadd.f32 1.0, %v2461_v58  ;;  %v2463_v32 = vpop.eup %2462 }
 0x63c   :  { %2466 = vtanh.f32 %v1602_v21  ;;  %v1614_v30 = vadd.f32 1.0, %v2463_v32 }
 0x63d   :  { %2468 = vrcp.f32 %v1613_v28 }
 0x63e   :  { %2470 = vrcp.f32 %v1614_v30 }
 0x648   :  { %v2465_v29 = vpop.eup %2464 }
 0x649   :  { %v2467_v26 = vpop.eup %2466 }
 0x64a   :  { %v2469_v25 = vpop.eup %2468  ;;  %v1626_v19 = vmul.f32 %v2467_v26, %v2465_v29 }
 0x64b   :  { %v1625_v27 = vmul.f32 %v2469_v25, %v1623_v17  ;;  %v2471_v12 = vpop.eup %2470 }
 0x64d   :  { %v3609_v38 = vadd.f32 %v1626_v19, %v1625_v27  ;;  %v2017_v27 = vld [vmem:[#allocation4] sm:$0xff]  ;;  %v2034_v19 = vld [vmem:[%s3749_s5 + $0x78] sm:$0xff] }
 0x64f   :  { %2472 = vtanh.f32 %v3609_v38  ;;  %v1816_v23 = vrot.slane %v3609_v38, 6  ;;  %v2033_v38 = vld [vmem:[%s3749_s5 + $0x70] sm:$0xff] }
 0x65c   :  { %v2473_v37 = vpop.eup %2472 }
 0x65d   :  { %v1629_v59 = vmul.f32 %v2473_v37, %v2471_v12  ;;  %v2032_v12 = vld [vmem:[%s3749_s5 + $0x68] sm:$0xff]  ;;  %v2031_v37 = vld [vmem:[%s3749_s5 + $0x60] sm:$0xff] }
 0x65f   :  { %1630 = vst [vmem:[#allocation4 + $0x8] sm:$0xc] %v1629_v59  ;;  %v1636_v58 = vrot.slane %v1629_v59, 2  ;;  %v2030_v59 = vld [vmem:[%s3749_s5 + $0x58] sm:$0xff] }
 0x661   :  { %1703 = vmatmul.mubr.f32.vlgmr.msra.gmra.mxu0 %v1636_v58  ;;  %1774 = vmatmul.mubr.f32.vlgmr.msra.gmra.mxu1 %v1636_v58  ;;  %v2029_v58 = vld [vmem:[%s3749_s5 + $0x50] sm:$0xff] }
 0x662   :  { %1832 = vmatpush1.msra.mxu0 %v3278_v8  ;;  %1903 = vmatpush1.msra.mxu1 %v3281_v61  ;;  %v3956_v8 = vld [vmem:[#allocation17_spill] sm:$0xff]  ;;  %v3957_v61 = vld [vmem:[#allocation18_spill] sm:$0xff] }
 0x663   :  { %1833 = vmatprep.subr.mxu0 %v3284_v3  ;;  %1904 = vmatprep.subr.mxu1 %v3287_v11  ;;  %v3958_v3 = vld [vmem:[#allocation19_spill] sm:$0xff]  ;;  %v3959_v11 = vld [vmem:[#allocation20_spill] sm:$0xff] }
 0x664   :  { %1834 = vmatpush1.msra.mxu0 %v3290_v14  ;;  %1905 = vmatpush1.msra.mxu1 %v3293_v63  ;;  %v3960_v14 = vld [vmem:[#allocation21_spill] sm:$0xff]  ;;  %v3961_v63 = vld [vmem:[#allocation22_spill] sm:$0xff] }
 0x665   :  { %1835 = vmatprep.subr.mxu0 %v3296_v60  ;;  %1906 = vmatprep.subr.mxu1 %v3299_v6  ;;  %v3962_v60 = vld [vmem:[#allocation23_spill] sm:$0xff]  ;;  %v3963_v6 = vld [vmem:[#allocation24_spill] sm:$0xff] }
 0x666   :  { %1836 = vmatpush1.msra.mxu0 %v3302_v9  ;;  %1907 = vmatpush1.msra.mxu1 %v3305_v1  ;;  %v3964_v9 = vld [vmem:[#allocation25_spill] sm:$0xff]  ;;  %v3965_v1 = vld [vmem:[#allocation26_spill] sm:$0xff] }
 0x667   :  { %1837 = vmatprep.subr.mxu0 %v3308_v0  ;;  %1908 = vmatprep.subr.mxu1 %v3311_v57  ;;  %v3966_v0 = vld [vmem:[#allocation27_spill] sm:$0xff]  ;;  %v3967_v57 = vld [vmem:[#allocation28_spill] sm:$0xff] }
 0x668   :  { %1838 = vmatpush1.msra.mxu0 %v3314_v2  ;;  %1909 = vmatpush1.msra.mxu1 %v3317_v5  ;;  %v3968_v2 = vld [vmem:[#allocation29_spill] sm:$0xff]  ;;  %v3969_v5 = vld [vmem:[#allocation30_spill] sm:$0xff] }
 0x669   :  { %1839 = vmatprep.subr.mxu0 %v3320_v50  ;;  %1910 = vmatprep.subr.mxu1 %v3915_v33  ;;  %v3970_v50 = vld [vmem:[#allocation31_spill] sm:$0xff] }
 0x66a   :  { %1840 = vmatpush1.msra.mxu0 %v3326_v15  ;;  %1911 = vmatpush1.msra.mxu1 %v3329_v62  ;;  %v3972_v15 = vld [vmem:[#allocation33_spill] sm:$0xff]  ;;  %v3973_v62 = vld [vmem:[#allocation34_spill] sm:$0xff] }
 0x66b   :  { %1841 = vmatprep.subr.mxu0 %v3332_v24  ;;  %1912 = vmatprep.subr.mxu1 %v3335_v4  ;;  %v3974_v24 = vld [vmem:[#allocation35_spill] sm:$0xff]  ;;  %v3975_v4 = vmov 0.0  }
 0x66c   :  { %1842 = vmatpush1.msra.mxu0 %v3338_v7  ;;  %1913 = vmatpush1.msra.mxu1 %v3341_v31  ;;  %v3971_v31 = vld [vmem:[#allocation32_spill] sm:$0xff] }
 0x66d   :  { %1843 = vmatprep.subr.mxu0 %v3414_v34  ;;  %1914 = vmatprep.subr.mxu1 %v3417_v36  ;;  %v3976_v7 = vld [vmem:[#allocation16_spill] sm:$0xff]  ;;  %v1631_v36 = vld [vmem:[#allocation3 + $0x8] sm:$0x30] }
 0x66e   :  { %1844 = vmatpush1.msra.mxu0 %v3420_v10  ;;  %1915 = vmatpush1.msra.mxu1 %v3423_v39 }
 0x66f   :  { %1845 = vmatprep.subr.mxu0 %v3426_v40  ;;  %1916 = vmatprep.subr.mxu1 %v3429_v41  ;;  %v1632_v41 = vld [vmem:[#allocation3 + $0x20] sm:$0x30] }
 0x670   :  { %1846 = vmatpush1.msra.mxu0 %v3432_v42  ;;  %1917 = vmatpush1.msra.mxu1 %v3435_v43 }
 0x671   :  { %1847 = vmatprep.subr.mxu0 %v3438_v44  ;;  %1918 = vmatprep.subr.mxu1 %v3441_v45 }
 0x672   :  { %1848 = vmatpush1.msra.mxu0 %v3444_v46  ;;  %1919 = vmatpush1.msra.mxu1 %v3447_v47  ;;  %v1633_v47 = vld [vmem:[#allocation3 + $0x28] sm:$0x30] }
 0x673   :  { %1849 = vmatprep.subr.mxu0 %v3450_v48  ;;  %1920 = vmatprep.subr.mxu1 %v3453_v49 }
 0x674   :  { %1850 = vmatpush1.msra.mxu0 %v3456_v51  ;;  %1921 = vmatpush1.msra.mxu1 %v3459_v52 }
 0x675   :  { %1851 = vmatprep.subr.mxu0 %v3462_v53  ;;  %1922 = vmatprep.subr.mxu1 %v3465_v54  ;;  %v1634_v53 = vld [vmem:[#allocation3 + $0x38] sm:$0x30] }
 0x676   :  { %1852 = vmatpush1.msra.mxu0 %v3468_v55  ;;  %1923 = vmatpush1.msra.mxu1 %v3471_v56 }
 0x677   :  { %1853 = vmatprep.subr.mxu0 %v3956_v8  ;;  %1924 = vmatprep.subr.mxu1 %v3957_v61  ;;  %v2028_v8 = vld [vmem:[%s3749_s5 + $0x48] sm:$0xff]  ;;  %v2027_v61 = vld [vmem:[%s3749_s5 + $0x40] sm:$0xff] }
 0x678   :  { %1854 = vmatpush1.msra.mxu0 %v3958_v3  ;;  %1925 = vmatpush1.msra.mxu1 %v3959_v11  ;;  %v2026_v3 = vld [vmem:[%s3749_s5 + $0x38] sm:$0xff]  ;;  %v2025_v11 = vld [vmem:[%s3749_s5 + $0x30] sm:$0xff] }
 0x679   :  { %1855 = vmatprep.subr.mxu0 %v3960_v14  ;;  %1926 = vmatprep.subr.mxu1 %v3961_v63  ;;  %v2024_v14 = vld [vmem:[%s3749_s5 + $0x28] sm:$0xff]  ;;  %v2023_v63 = vld [vmem:[%s3749_s5 + $0x20] sm:$0xff] }
 0x67a   :  { %1856 = vmatpush1.msra.mxu0 %v3962_v60  ;;  %1927 = vmatpush1.msra.mxu1 %v3963_v6  ;;  %v2022_v60 = vld [vmem:[%s3749_s5 + $0x18] sm:$0xff]  ;;  %v2021_v6 = vld [vmem:[%s3749_s5 + $0x10] sm:$0xff] }
 0x67b   :  { %1857 = vmatprep.subr.mxu0 %v3964_v9  ;;  %1928 = vmatprep.subr.mxu1 %v3965_v1  ;;  %v2020_v9 = vld [vmem:[%s3749_s5 + $0x8] sm:$0xff]  ;;  %v2019_v1 = vld [vmem:[%s3749_s5] sm:$0xff] }
 0x67c   :  { %1858 = vmatpush1.msra.mxu0 %v3966_v0  ;;  %1929 = vmatpush1.msra.mxu1 %v3967_v57 }
 0x67d   :  { %1859 = vmatprep.subr.mxu0 %v3968_v2  ;;  %1930 = vmatprep.subr.mxu1 %v3969_v5  ;;  %v1824_v2 = vld [vmem:[#allocation3 + $0x8] sm:$0xc0] }
 0x67e   :  { %1860 = vmatpush1.msra.mxu0 %v3970_v50  ;;  %1931 = vmatpush1.msra.mxu1 %v3971_v31 }
 0x67f   :  { %1861 = vmatprep.subr.mxu0 %v3972_v15  ;;  %1932 = vmatprep.subr.mxu1 %v3973_v62  ;;  %v1825_v15 = vld [vmem:[#allocation3 + $0x20] sm:$0xc0] }
 0x680   :  { %1862 = vmatpush1.msra.mxu0 %v3974_v24  ;;  %1895 = vmatprep.mubr.f32.mxu0 %v3975_v4 }
 0x681   :  { %1933 = vmatpush1.msra.mxu1 %v3976_v7  ;;  %1966 = vmatprep.mubr.f32.mxu1 %v3975_v4 }
 0x682   :  { %2337 = vmatprep.subr.mxu0 %v2034_v19 }
 0x721   :  { %v1704_v33 = vpop.f32.mrf.mxu0  ;;  %v1775_v44 = vpop.f32.mrf.mxu1 }
 0x722   :  { %v1784_v34 = vrot.slane %v1704_v33, 4  ;;  %v1786_v46 = vrot.slane %v1775_v44, 4 }
 0x723   :  { %v1706_v10 = vpop.f32.mrf.mxu0  ;;  %v1777_v48 = vpop.f32.mrf.mxu1 }
 0x724   :  { %v1792_v39 = vadd.f32 %v1784_v34, %v1631_v36  ;;  %v1785_v40 = vrot.slane %v1706_v10, 4  ;;  %v1794_v49 = vadd.f32 %v1786_v46, %v1633_v47  ;;  %v1787_v51 = vrot.slane %v1777_v48, 4  ;;  %v1826_v34 = vld [vmem:[#allocation3 + $0x28] sm:$0xc0] }
 0x726   :  { %v2280_v42 = vmul.f32 -1.442695, %v1792_v39  ;;  %v1793_v43 = vadd.f32 %v1785_v40, %v1632_v41  ;;  %v2282_v52 = vmul.f32 -1.442695, %v1794_v49  ;;  %v1795_v55 = vadd.f32 %v1787_v51, %v1634_v53  ;;  %v1827_v41 = vld [vmem:[#allocation3 + $0x38] sm:$0xc0] }
 0x728   :  { %2474 = vpow2.f32 %v2280_v42  ;;  %v2281_v45 = vmul.f32 -1.442695, %v1793_v43 }
 0x72a   :  { %2476 = vpow2.f32 %v2281_v45 }
 0x72b   :  { %2478 = vpow2.f32 %v2282_v52 }
 0x735   :  { %v2475_v54 = vpop.eup %2474 }
 0x736   :  { %v1805_v56 = vadd.f32 1.0, %v2475_v54 }
 0x737   :  { %v2477_v18 = vpop.eup %2476 }
 0x738   :  { %2480 = vrcp.f32 %v1805_v56  ;;  %v1806_v20 = vadd.f32 1.0, %v2477_v18  ;;  %v2479_v35 = vpop.eup %2478 }
 0x739   :  { %2482 = vtanh.f32 %v1795_v55  ;;  %v1807_v21 = vadd.f32 1.0, %v2479_v35 }
 0x73a   :  { %2484 = vrcp.f32 %v1806_v20 }
 0x73b   :  { %2486 = vrcp.f32 %v1807_v21 }
 0x745   :  { %v2481_v16 = vpop.eup %2480 }
 0x746   :  { %v2483_v13 = vpop.eup %2482 }
 0x747   :  { %v2485_v22 = vpop.eup %2484  ;;  %v1819_v32 = vmul.f32 %v2483_v13, %v2481_v16 }
 0x748   :  { %v1818_v28 = vmul.f32 %v2485_v22, %v1816_v23  ;;  %v2487_v26 = vpop.eup %2486  ;;  %v2286_v23 = vld [vmem:[%s3750_s6] ss:$0 sm:$0xff] }
 0x74a   :  { %v3677_v29 = vadd.f32 %v1819_v32, %v1818_v28 }
 0x74c   :  { %2488 = vtanh.f32 %v3677_v29  ;;  %v2009_v51 = vrot.slane %v3677_v29, 6 }
 0x759   :  { %v2489_v17 = vpop.eup %2488 }
 0x75a   :  { %v1822_v25 = vmul.f32 %v2489_v17, %v2487_v26 }
 0x75c   :  { %1823 = vst [vmem:[#allocation4 + $0x8] sm:$0x30] %v1822_v25  ;;  %v1829_v30 = vrot.slane %v1822_v25, 4 }
 0x75e   :  { %1896 = vmatmul.mubr.f32.vlgmr.msra.gmra.mxu0 %v1829_v30  ;;  %1967 = vmatmul.mubr.f32.vlgmr.msra.gmra.mxu1 %v1829_v30 }
 0x75f   :  { %2369 = vmatprep.mubr.f32.mxu0 %v2017_v27  ;;  %2338 = vmatpush3.msra.mxu0 %v2034_v19 }
 0x760   :  { %2339 = vmatprep.subr.mxu0 %v2033_v38 }
 0x761   :  { %2340 = vmatpush3.msra.mxu0 %v2033_v38 }
 0x762   :  { %2341 = vmatprep.subr.mxu0 %v2032_v12 }
 0x763   :  { %2342 = vmatpush3.msra.mxu0 %v2032_v12 }
 0x764   :  { %2343 = vmatprep.subr.mxu0 %v2031_v37 }
 0x765   :  { %2344 = vmatpush3.msra.mxu0 %v2031_v37 }
 0x766   :  { %2345 = vmatprep.subr.mxu0 %v2030_v59 }
 0x767   :  { %2346 = vmatpush3.msra.mxu0 %v2030_v59 }
 0x768   :  { %2347 = vmatprep.subr.mxu0 %v2029_v58 }
 0x769   :  { %2348 = vmatpush3.msra.mxu0 %v2029_v58 }
 0x76a   :  { %2349 = vmatprep.subr.mxu0 %v2028_v8 }
 0x76b   :  { %2350 = vmatpush3.msra.mxu0 %v2028_v8 }
 0x76c   :  { %2351 = vmatprep.subr.mxu0 %v2027_v61 }
 0x76d   :  { %2352 = vmatpush3.msra.mxu0 %v2027_v61 }
 0x76e   :  { %2353 = vmatprep.subr.mxu0 %v2026_v3 }
 0x76f   :  { %2354 = vmatpush3.msra.mxu0 %v2026_v3 }
 0x770   :  { %2355 = vmatprep.subr.mxu0 %v2025_v11 }
 0x771   :  { %2356 = vmatpush3.msra.mxu0 %v2025_v11 }
 0x772   :  { %2357 = vmatprep.subr.mxu0 %v2024_v14 }
 0x773   :  { %2358 = vmatpush3.msra.mxu0 %v2024_v14 }
 0x774   :  { %2359 = vmatprep.subr.mxu0 %v2023_v63 }
 0x775   :  { %2360 = vmatpush3.msra.mxu0 %v2023_v63 }
 0x776   :  { %2361 = vmatprep.subr.mxu0 %v2022_v60 }
 0x777   :  { %2362 = vmatpush3.msra.mxu0 %v2022_v60 }
 0x778   :  { %2363 = vmatprep.subr.mxu0 %v2021_v6 }
 0x779   :  { %2364 = vmatpush3.msra.mxu0 %v2021_v6 }
 0x77a   :  { %2365 = vmatprep.subr.mxu0 %v2020_v9 }
 0x77b   :  { %2366 = vmatpush3.msra.mxu0 %v2020_v9 }
 0x77c   :  { %2367 = vmatprep.subr.mxu0 %v2019_v1 }
 0x77d   :  { %2368 = vmatpush3.msra.mxu0 %v2019_v1 }
 0x81e   :  { %v1897_v0 = vpop.f32.mrf.mxu0  ;;  %v1968_v4 = vpop.f32.mrf.mxu1 }
 0x81f   :  { %v1977_v57 = vrot.slane %v1897_v0, 2  ;;  %v1979_v33 = vrot.slane %v1968_v4, 2 }
 0x820   :  { %v1899_v5 = vpop.f32.mrf.mxu0  ;;  %v1970_v36 = vpop.f32.mrf.mxu1 }
 0x821   :  { %v1985_v50 = vadd.f32 %v1977_v57, %v1824_v2  ;;  %v1978_v31 = vrot.slane %v1899_v5, 2  ;;  %v1987_v10 = vadd.f32 %v1979_v33, %v1826_v34  ;;  %v1980_v39 = vrot.slane %v1970_v36, 2 }
 0x823   :  { %v2283_v62 = vmul.f32 -1.442695, %v1985_v50  ;;  %v1986_v24 = vadd.f32 %v1978_v31, %v1825_v15  ;;  %v2285_v40 = vmul.f32 -1.442695, %v1987_v10  ;;  %v1988_v43 = vadd.f32 %v1980_v39, %v1827_v41 }
 0x825   :  { %2490 = vpow2.f32 %v2283_v62  ;;  %v2284_v7 = vmul.f32 -1.442695, %v1986_v24 }
 0x827   :  { %2492 = vpow2.f32 %v2284_v7 }
 0x828   :  { %2494 = vpow2.f32 %v2285_v40 }
 0x832   :  { %v2491_v42 = vpop.eup %2490 }
 0x833   :  { %v1998_v44 = vadd.f32 1.0, %v2491_v42 }
 0x834   :  { %v2493_v45 = vpop.eup %2492 }
 0x835   :  { %2496 = vrcp.f32 %v1998_v44  ;;  %v1999_v46 = vadd.f32 1.0, %v2493_v45  ;;  %v2495_v47 = vpop.eup %2494 }
 0x836   :  { %2498 = vtanh.f32 %v1988_v43  ;;  %v2000_v53 = vadd.f32 1.0, %v2495_v47 }
 0x837   :  { %2500 = vrcp.f32 %v1999_v46 }
 0x838   :  { %2502 = vrcp.f32 %v2000_v53 }
 0x842   :  { %v2497_v48 = vpop.eup %2496 }
 0x843   :  { %v2499_v49 = vpop.eup %2498 }
 0x844   :  { %v2501_v52 = vpop.eup %2500  ;;  %v2012_v55 = vmul.f32 %v2499_v49, %v2497_v48 }
 0x845   :  { %v2011_v54 = vmul.f32 %v2501_v52, %v2009_v51  ;;  %v2503_v18 = vpop.eup %2502 }
 0x847   :  { %v2013_v56 = vadd.f32 %v2012_v55, %v2011_v54 }
 0x849   :  { %2504 = vtanh.f32 %v2013_v56 }
 0x856   :  { %v2505_v20 = vpop.eup %2504 }
 0x857   :  { %v2015_v35 = vmul.f32 %v2505_v20, %v2503_v18 }
 0x859   :  { %2016 = vst [vmem:[#allocation4 + $0x8] sm:$0xc0] %v2015_v35 }
 0x860   :  { %v2018_v16 = vld [vmem:[#allocation4 + $0x8] sm:$0xff] }
 0x861   :  { %2370 = vmatmul.mubr.f32.vlgmr.msra.gmra.mxu0 %v2018_v16 }
 0x921   :  { %v2371_v13 = vpop.f32.mrf.mxu0 }
 0x922   :  { %v2114_v28 = vadd.f32 %v2371_v13, %v2286_v23 }
 0x923   :  { %v2108_v22 = vpop.f32.mrf.mxu0 }
 0x924   :  { %v2109_v21 = vadd.f32 %v2286_v23, %v2108_v22  ;;  %v2121_v29 = vsel %vm2117_vm0, %v2114_v28, -inf }
 0x926   :  { %v2118_v32 = vsel %vm2117_vm0, %v2109_v21, -inf }
 0x927   :  { %2119 = vmax.xlane.f32.xlu0 %v2118_v32 }
 0x92b   :  { %2122 = vmax.xlane.f32.xlu0 %v2121_v29 }
 0x9b0   :  { %v2120_v26 = vpop.xlane.xlu0 %2119 }
 0x9b1   :  { %v2124_v17 = vsub.f32 %v2109_v21, %v2120_v26 }
 0x9b3   :  { %v2126_v25 = vmul.f32 1.442695, %v2124_v17 }
 0x9b4   :  { %v2123_v30 = vpop.xlane.xlu0 %2122 }
 0x9b5   :  { %2506 = vpow2.f32 %v2126_v25  ;;  %v2125_v27 = vsub.f32 %v2114_v28, %v2123_v30 }
 0x9b7   :  { %v2128_v19 = vmul.f32 1.442695, %v2125_v27 }
 0x9b9   :  { %2508 = vpow2.f32 %v2128_v19 }
 0x9c2   :  { %v2507_v38 = vpop.eup %2506 }
 0x9c3   :  { %v2130_v12 = vsel %vm2117_vm0, %v2507_v38, 0.0 }
 0x9c4   :  { %2131 = vadd.xlane.f32.xlu1 %v2130_v12 }
 0x9c6   :  { %v2509_v37 = vpop.eup %2508 }
 0x9c7   :  { %v2133_v59 = vsel %vm2117_vm0, %v2509_v37, 0.0 }
 0x9c8   :  { %2134 = vadd.xlane.f32.xlu1 %v2133_v59 }
 0xa4d   :  { %v2132_v58 = vpop.xlane.xlu1 %2131 }
 0xa4e   :  { %2510 = vlog2.f32 %v2132_v58 }
 0xa51   :  { %v2135_v8 = vpop.xlane.xlu1 %2134 }
 0xa52   :  { %2512 = vlog2.f32 %v2135_v8 }
 0xa5b   :  { %v2511_v61 = vpop.eup %2510 }
 0xa5c   :  { %v2137_v3 = vmul.f32 0.6931472, %v2511_v61 }
 0xa5e   :  { %v2140_v11 = vsub.f32 %v2124_v17, %v2137_v3 }
 0xa5f   :  { %v2513_v14 = vpop.eup %2512 }
 0xa60   :  { %2142 = vst.msk [vmem:[%s3751_s7] sm:$0xff] %vm2117_vm0, %v2140_v11  ;;  %v2139_v63 = vmul.f32 0.6931472, %v2513_v14 }
 0xa62   :  { %v2141_v60 = vsub.f32 %v2125_v27, %v2139_v63 }
 0xa64   :  { %2143 = vst.msk [vmem:[%s3751_s7 + $0x8] sm:$0xff] %vm2117_vm0, %v2141_v60 }
 0xa65   :  { %2148 = vsyncpa [#allocation6], 1 }
 0xa66   :  { %2149 = vsyncpa [#allocation10], 1 }
 0xa67   :  { %2150 = vsyncpa [#allocation7], 1 }

</bundles_post_ra>
